<compile_context>
chip_gen: v7x
topology: tpu7x:2x2x1
jax: 0.10.0
libtpu: 0.0.40
codegen_flags: <defaults>
</compile_context>

<pallas_src>
import functools

import jax
import jax.numpy as jnp
from jax import lax
from jax.experimental import pallas as pl
from jax.experimental.pallas import tpu as pltpu


def _tgl_kernel(zf_ref, xf_ref,
                wx_ref, bx_ref,      # stacked [query ; g_xf] conv weights / bias
                wz_ref, bz_ref,      # stacked [support ; g_zf] conv weights / bias
                wfi_ref, bfi_ref,    # fi conv (on concat([embedding, xf_g]))
                out_ref,
                zs_scr, zg_scr,
                *, exp_dtype, num_q_tiles):
    f32 = jnp.float32
    bf16 = jnp.bfloat16
    Cp = zs_scr.shape[0]

    # ---- full-key convs: once per batch row, reused across all query tiles ----
    @pl.when(pl.program_id(1) == 0)
    def _():
        zsg = jnp.dot(wz_ref[...], zf_ref[...], preferred_element_type=f32) + bz_ref[...]
        zs_scr[...] = zsg[:Cp, :]                                   # support transform (keys)
        zg_scr[...] = jnp.maximum(zsg[Cp:, :], 0.0).astype(bf16)    # g_zf, ReLU

    # ---- per-query-tile convs: one stacked (2Cp,Cp)@(Cp,TQ) matmul ----
    xfq = xf_ref[...]                                               # (Cp, TQ) bf16
    xqg = jnp.dot(wx_ref[...], xfq, preferred_element_type=f32) + bx_ref[...]
    xq = xqg[:Cp, :]                                                # query transform
    xg = jnp.maximum(xqg[Cp:, :], 0.0)                              # g_xf, ReLU

    # query-position slice of the (cached) support transform
    if num_q_tiles == 1:
        zs_q = zs_scr[...]
    else:
        tq = xfq.shape[-1]
        q0 = pl.multiple_of(pl.program_id(1) * tq, tq)
        zs_q = zs_scr[:, pl.ds(q0, tq)]

    # fused similarity: similar1 - 0.1*similar2 == (xq - 0.1*zs)^T @ zs_keys
    # dot_general contracts dim 0 of both operands -> (TQ, N), no XLU transpose.
    a = (xq - 0.1 * zs_q).astype(bf16)
    s = lax.dot_general(a, zs_scr[...].astype(bf16),
                        (((0,), (0,)), ((), ())),
                        preferred_element_type=f32)                 # (TQ, N)

    # softmax over keys; exp in exp_dtype (bf16 on v6e/v7x), f32 accumulation.
    s = s - jnp.max(s, axis=-1, keepdims=True)
    p = jnp.exp(s.astype(exp_dtype))
    denom = jnp.sum(p.astype(f32), axis=-1, keepdims=True)
    p = p * pl.reciprocal(denom, approx=True).astype(exp_dtype)

    # attention-weighted support embedding: emb[c, q] = sum_m zg[c, m] * p[q, m]
    emb = lax.dot_general(zg_scr[...], p.astype(bf16),
                          (((1,), (1,)), ((), ())),
                          preferred_element_type=f32)               # (Cp, TQ)

    # fi on concat([embedding, xf_g], channel): single (Cout, 2Cp) matmul.
    cat = jnp.concatenate([emb.astype(bf16), xg.astype(bf16)], axis=0)   # (2Cp, TQ)
    out = jnp.dot(wfi_ref[...], cat, preferred_element_type=f32) + bfi_ref[...]
    out_ref[...] = jnp.maximum(out, 0.0)


def _device_kind():
    try:
        return jax.devices()[0].device_kind.lower()
    except Exception:
        return ""


def _pad2(w, rows, cols):
    r, c = w.shape
    return jnp.pad(w, ((0, rows - r), (0, cols - c)))


def tgl_fusion_pallas(zf_nchw, xf_nchw, params, *, q_tile=None):
    """zf, xf: (B, C, H, W) float32 (same shapes). Returns (B, Cout, H, W) float32."""
    assert zf_nchw.shape == xf_nchw.shape
    B, C, H, W = xf_nchw.shape
    N = H * W
    Cout = params["bfi"].shape[0]

    kind = _device_kind()
    is_v7 = ("v7" in kind) or ("tpu7" in kind)
    use_bf16_exp = is_v7 or ("v6" in kind)          # v5e/older: no bf16 EUP -> keep f32
    exp_dtype = jnp.bfloat16 if use_bf16_exp else jnp.float32
    max_tile = 256 if is_v7 else 1024               # v7x: 64 MiB VMEM; v5e/v6e: 128 MiB
    vmem_limit = (40 if is_v7 else 96) * 1024 * 1024

    if q_tile is None:
        q_tile = N if N <= max_tile else max_tile
    assert N % q_tile == 0, (N, q_tile)
    if q_tile != N:
        assert q_tile % 128 == 0, q_tile            # keep output stores lane-dense
    nq = N // q_tile
    # TODO(synk): for very large N on v7x, add flash-style key tiling (online
    # softmax) instead of holding the full (TQ, N) scoreboard in VMEM.

    bf16 = jnp.bfloat16
    # Pad channels to the bf16 sublane tile so vregs / MXU rows are full.
    SUB = 16
    Cp = max(SUB, ((C + SUB - 1) // SUB) * SUB)
    pad_c = Cp - C

    # NCHW -> (B, C, N): pure reshape (N is the lane dim); zero-pad channels; bf16.
    zf = zf_nchw.reshape(B, C, N)
    xf = xf_nchw.reshape(B, C, N)
    if pad_c:
        zf = jnp.pad(zf, ((0, 0), (0, pad_c), (0, 0)))
        xf = jnp.pad(xf, ((0, 0), (0, pad_c), (0, 0)))
    zf = zf.astype(bf16)
    xf = xf.astype(bf16)

    # Stack + pad the small 1x1-conv weights (BN already folded by make_params).
    wx = jnp.concatenate([_pad2(params["wq"], Cp, Cp),
                          _pad2(params["wgx"], Cp, Cp)], axis=0).astype(bf16)   # (2Cp, Cp)
    bx = jnp.concatenate([_pad2(params["bq"], Cp, 1),
                          _pad2(params["bgx"], Cp, 1)], axis=0)                 # (2Cp, 1) f32
    wz = jnp.concatenate([_pad2(params["ws"], Cp, Cp),
                          _pad2(params["wgz"], Cp, Cp)], axis=0).astype(bf16)   # (2Cp, Cp)
    bz = jnp.concatenate([_pad2(params["bs"], Cp, 1),
                          _pad2(params["bgz"], Cp, 1)], axis=0)                 # (2Cp, 1) f32
    wfi = jnp.concatenate([_pad2(params["wfi_e"], Cout, Cp),
                           _pad2(params["wfi_x"], Cout, Cp)], axis=1).astype(bf16)  # (Cout, 2Cp)
    bfi = params["bfi"]                                                          # (Cout, 1) f32

    weights = (wx, bx, wz, bz, wfi, bfi)

    w_spec = lambda a: pl.BlockSpec(a.shape, lambda b, q: (0, 0))
    in_specs = [
        pl.BlockSpec((None, Cp, N), lambda b, q: (b, 0, 0)),        # zf: full key set (DMA'd once per b)
        pl.BlockSpec((None, Cp, q_tile), lambda b, q: (b, 0, q)),   # xf: query-row tile
    ] + [w_spec(w) for w in weights]
    out_specs = pl.BlockSpec((None, Cout, q_tile), lambda b, q: (b, 0, q))

    cost = pl.CostEstimate(
        flops=int(2 * B * (2 * (2 * Cp) * Cp * N        # stacked full-key + query convs
                           + 2 * N * N * Cp             # similarity + emb matmuls
                           + Cout * 2 * Cp * N)),       # fi
        transcendentals=int(B * N * (N + 1)),
        bytes_accessed=int(2 * 2 * B * Cp * N + 4 * B * Cout * N
                           + 2 * (2 * (2 * Cp) * Cp + Cout * 2 * Cp)
                           + 4 * (2 * (2 * Cp) + Cout)),
    )

    kernel = functools.partial(_tgl_kernel, exp_dtype=exp_dtype, num_q_tiles=nq)

    out = pl.pallas_call(
        kernel,
        out_shape=jax.ShapeDtypeStruct((B, Cout, N), jnp.float32),
        grid_spec=pltpu.PrefetchScalarGridSpec(
            num_scalar_prefetch=0,
            grid=(B, nq),
            in_specs=in_specs,
            out_specs=out_specs,
            scratch_shapes=[pltpu.VMEM((Cp, N), jnp.float32),   # zs (support transform, keys)
                            pltpu.VMEM((Cp, N), jnp.bfloat16)], # zg (g_zf, ReLU'd, MXU-ready)
        ),
        compiler_params=pltpu.CompilerParams(
            dimension_semantics=("parallel", "arbitrary"),
            vmem_limit_bytes=vmem_limit,
        ),
        cost_estimate=cost,
    )(zf, xf, *weights)

    # (B, Cout, N) -> NCHW: pure reshape.
    return out.reshape(B, Cout, H, W)


def _fold_bn(w, b, gamma, beta, mean, var, eps=1e-5):
    """Fold eval-mode BatchNorm into a preceding 1x1 conv; w: (Cout, Cin)."""
    scale = gamma / jnp.sqrt(var + eps)
    return w * scale[:, None], (b - mean) * scale + beta


def make_params(key, in_channel, out_channel):
    C, Co = in_channel, out_channel
    keys = jax.random.split(key, 16)
    u = lambda k, shp, s=0.1: jax.random.uniform(k, shp, jnp.float32, -s, s)

    # plain convs (weights stored channels-first: (Cout, Cin))
    wq, bq = u(keys[0], (C, C)), u(keys[1], (C,))
    ws, bs = u(keys[2], (C, C)), u(keys[3], (C,))

    # conv + BN (deterministic synthetic BN stats)
    def conv_bn(kw, kb, kg, cin, cout):
        w, b = u(kw, (cout, cin)), u(kb, (cout,))
        gamma = 1.0 + 0.05 * jnp.arange(cout, dtype=jnp.float32)
        beta = 0.01 * jnp.arange(cout, dtype=jnp.float32)
        mean = u(kg, (cout,), 0.05)
        var = 1.0 + 0.1 * jnp.abs(u(kg, (cout,), 1.0))
        return _fold_bn(w, b, gamma, beta, mean, var)

    wgx, bgx = conv_bn(keys[4], keys[5], keys[6], C, C)
    wgz, bgz = conv_bn(keys[7], keys[8], keys[9], C, C)
    wfi, bfi = conv_bn(keys[10], keys[11], keys[12], 2 * C, Co)

    return dict(
        wq=wq, bq=bq.reshape(C, 1),
        ws=ws, bs=bs.reshape(C, 1),
        wgx=wgx, bgx=bgx.reshape(C, 1),
        wgz=wgz, bgz=bgz.reshape(C, 1),
        wfi_e=wfi[:, :C], wfi_x=wfi[:, C:], bfi=bfi.reshape(Co, 1),
    )


def tgl_fusion_reference(zf_nchw, xf_nchw, p):
    """Plain-JAX f32 reference mirroring the PyTorch forward (correctness check)."""
    B, C, H, W = xf_nchw.shape
    N = H * W
    z = zf_nchw.reshape(B, C, N)
    x = xf_nchw.reshape(B, C, N)
    conv = lambda w, b, t: jnp.einsum("oc,bcn->bon", w, t) + b[None]
    xq = conv(p["wq"], p["bq"], x)
    zs = conv(p["ws"], p["bs"], z)
    xg = jax.nn.relu(conv(p["wgx"], p["bgx"], x))
    zg = jax.nn.relu(conv(p["wgz"], p["bgz"], z))
    s1 = jnp.einsum("bcn,bcm->bnm", xq, zs)
    s2 = jnp.einsum("bcn,bcm->bnm", zs, zs)
    pr = jax.nn.softmax(s1 - 0.1 * s2, axis=2)
    emb = jnp.einsum("bnm,bcm->bcn", pr, zg)
    out = jax.nn.relu(conv(p["wfi_e"], p["bfi"], emb)
                      + jnp.einsum("oc,bcn->bon", p["wfi_x"], xg))
    return out.reshape(B, -1, H, W)


if __name__ == "__main__":
    # PyTorch module requires Hz*Wz == Hx*Wx; N = 256 keeps the lane dim dense.
    B, C, H, W = 2, 8, 16, 16
    Cout = 16

    key = jax.random.PRNGKey(0)
    k_zf, k_xf, k_p = jax.random.split(key, 3)
    zf = jax.random.normal(k_zf, (B, C, H, W), jnp.float32)
    xf = jax.random.normal(k_xf, (B, C, H, W), jnp.float32)
    params = make_params(k_p, C, Cout)

    out = jax.block_until_ready(tgl_fusion_pallas(zf, xf, params))
    ref = jax.block_until_ready(tgl_fusion_reference(zf, xf, params))

    assert out.shape == (B, Cout, H, W), out.shape
    max_err = float(jnp.max(jnp.abs(out - ref)))
    # bf16 MXU operands (and bf16 exp on v6e/v7x) -> loosened tolerance.
    assert jnp.allclose(out, ref, atol=2e-2, rtol=2e-2), max_err
    print("KERNEL_OK")
</pallas_src>

<mosaic_0001>
module attributes {stable_mosaic.version = 11 : i64} {
  func.func @_tgl_kernel(%arg0: i32, %arg1: i32, %arg2: memref<1x16x256xbf16, #tpu.memory_space<vmem>>, %arg3: memref<1x16x256xbf16, #tpu.memory_space<vmem>>, %arg4: memref<32x16xbf16, #tpu.memory_space<vmem>>, %arg5: memref<32x1xf32, #tpu.memory_space<vmem>>, %arg6: memref<32x16xbf16, #tpu.memory_space<vmem>>, %arg7: memref<32x1xf32, #tpu.memory_space<vmem>>, %arg8: memref<16x32xbf16, #tpu.memory_space<vmem>>, %arg9: memref<16x1xf32, #tpu.memory_space<vmem>>, %arg10: memref<1x16x256xf32, #tpu.memory_space<vmem>>, %arg11: memref<16x256xf32, #tpu.memory_space<vmem>>, %arg12: memref<16x256xbf16, #tpu.memory_space<vmem>>) attributes {dimension_semantics = [#tpu.dimension_semantics<parallel>, #tpu.dimension_semantics<arbitrary>], iteration_bounds = array<i64: 2, 1>, scalar_prefetch = 0 : i64, scratch_operands = 2 : i64, tpu.core_type = #tpu.core_type<tc>, window_params = [{transform_indices = @transform_0, window_bounds = array<i64: 1, 16, 256>}, {transform_indices = @transform_1, window_bounds = array<i64: 1, 16, 256>}, {pipeline_mode = #tpu.pipeline_mode<synchronous>, transform_indices = @transform_2, window_bounds = array<i64: 32, 16>}, {pipeline_mode = #tpu.pipeline_mode<synchronous>, transform_indices = @transform_3, window_bounds = array<i64: 32, 1>}, {pipeline_mode = #tpu.pipeline_mode<synchronous>, transform_indices = @transform_4, window_bounds = array<i64: 32, 16>}, {pipeline_mode = #tpu.pipeline_mode<synchronous>, transform_indices = @transform_5, window_bounds = array<i64: 32, 1>}, {pipeline_mode = #tpu.pipeline_mode<synchronous>, transform_indices = @transform_6, window_bounds = array<i64: 16, 32>}, {pipeline_mode = #tpu.pipeline_mode<synchronous>, transform_indices = @transform_7, window_bounds = array<i64: 16, 1>}, {transform_indices = @transform_8, window_bounds = array<i64: 1, 16, 256>}]} {
    %c0_i32 = arith.constant 0 : i32
    %0 = arith.cmpi eq, %arg1, %c0_i32 : i32
    %1 = arith.extui %0 : i1 to i32
    %c0_i32_0 = arith.constant 0 : i32
    %2 = arith.cmpi ne, %1, %c0_i32_0 : i32
    scf.if %2 {
      %c0_28 = arith.constant 0 : index
      %c0_29 = arith.constant 0 : index
      %48 = vector.load %arg6[%c0_28, %c0_29] : memref<32x16xbf16, #tpu.memory_space<vmem>>, vector<32x16xbf16>
      %c0_30 = arith.constant 0 : index
      %c0_31 = arith.constant 0 : index
      %c0_32 = arith.constant 0 : index
      %49 = vector.load %arg2[%c0_30, %c0_31, %c0_32] : memref<1x16x256xbf16, #tpu.memory_space<vmem>>, vector<1x16x256xbf16>
      %50 = vector.shape_cast %49 : vector<1x16x256xbf16> to vector<16x256xbf16>
      %cst_33 = arith.constant dense<0.000000e+00> : vector<32x256xf32>
      %51 = tpu.matmul %48, %50, %cst_33 {dimension_numbers = #tpu.dot_dimension_numbers<[1], [0], [0], [1], [0, 0, 1, 1], [], []>} : vector<32x16xbf16>, vector<16x256xbf16>, vector<32x256xf32> -> vector<32x256xf32>
      %c0_34 = arith.constant 0 : index
      %c0_35 = arith.constant 0 : index
      %52 = vector.load %arg7[%c0_34, %c0_35] : memref<32x1xf32, #tpu.memory_space<vmem>>, vector<32x1xf32>
      %53 = vector.broadcast %52 : vector<32x1xf32> to vector<32x256xf32>
      %54 = arith.addf %51, %53 : vector<32x256xf32>
      %55 = vector.extract_strided_slice %54 {offsets = [0, 0], sizes = [16, 256], strides = [1, 1]} : vector<32x256xf32> to vector<16x256xf32>
      %c0_36 = arith.constant 0 : index
      %c0_37 = arith.constant 0 : index
      %56 = vector.load %arg11[%c0_36, %c0_37] : memref<16x256xf32, #tpu.memory_space<vmem>>, vector<16x256xf32>
      tpu.vector_store %arg11[%c0_36, %c0_37], %55 {strides = array<i32>} : memref<16x256xf32, #tpu.memory_space<vmem>>, vector<16x256xf32>,
      %57 = vector.extract_strided_slice %54 {offsets = [16, 0], sizes = [16, 256], strides = [1, 1]} : vector<32x256xf32> to vector<16x256xf32>
      %cst_38 = arith.constant 0.000000e+00 : f32
      %58 = vector.broadcast %cst_38 : f32 to vector<16x256xf32>
      %59 = arith.maximumf %57, %58 : vector<16x256xf32>
      %60 = arith.truncf %59 : vector<16x256xf32> to vector<16x256xbf16>
      %c0_39 = arith.constant 0 : index
      %c0_40 = arith.constant 0 : index
      %61 = vector.load %arg12[%c0_39, %c0_40] : memref<16x256xbf16, #tpu.memory_space<vmem>>, vector<16x256xbf16>
      tpu.vector_store %arg12[%c0_39, %c0_40], %60 {strides = array<i32>} : memref<16x256xbf16, #tpu.memory_space<vmem>>, vector<16x256xbf16>,
    } else {
    }
    %c0 = arith.constant 0 : index
    %c0_1 = arith.constant 0 : index
    %c0_2 = arith.constant 0 : index
    %3 = vector.load %arg3[%c0, %c0_1, %c0_2] : memref<1x16x256xbf16, #tpu.memory_space<vmem>>, vector<1x16x256xbf16>
    %4 = vector.shape_cast %3 : vector<1x16x256xbf16> to vector<16x256xbf16>
    %c0_3 = arith.constant 0 : index
    %c0_4 = arith.constant 0 : index
    %5 = vector.load %arg4[%c0_3, %c0_4] : memref<32x16xbf16, #tpu.memory_space<vmem>>, vector<32x16xbf16>
    %cst = arith.constant dense<0.000000e+00> : vector<32x256xf32>
    %6 = tpu.matmul %5, %4, %cst {dimension_numbers = #tpu.dot_dimension_numbers<[1], [0], [0], [1], [0, 0, 1, 1], [], []>} : vector<32x16xbf16>, vector<16x256xbf16>, vector<32x256xf32> -> vector<32x256xf32>
    %c0_5 = arith.constant 0 : index
    %c0_6 = arith.constant 0 : index
    %7 = vector.load %arg5[%c0_5, %c0_6] : memref<32x1xf32, #tpu.memory_space<vmem>>, vector<32x1xf32>
    %8 = vector.broadcast %7 : vector<32x1xf32> to vector<32x256xf32>
    %9 = arith.addf %6, %8 : vector<32x256xf32>
    %10 = vector.extract_strided_slice %9 {offsets = [0, 0], sizes = [16, 256], strides = [1, 1]} : vector<32x256xf32> to vector<16x256xf32>
    %11 = vector.extract_strided_slice %9 {offsets = [16, 0], sizes = [16, 256], strides = [1, 1]} : vector<32x256xf32> to vector<16x256xf32>
    %cst_7 = arith.constant 0.000000e+00 : f32
    %12 = vector.broadcast %cst_7 : f32 to vector<16x256xf32>
    %13 = arith.maximumf %11, %12 : vector<16x256xf32>
    %c0_8 = arith.constant 0 : index
    %c0_9 = arith.constant 0 : index
    %14 = vector.load %arg11[%c0_8, %c0_9] : memref<16x256xf32, #tpu.memory_space<vmem>>, vector<16x256xf32>
    %cst_10 = arith.constant 1.000000e-01 : f32
    %15 = vector.broadcast %cst_10 : f32 to vector<16x256xf32>
    %16 = arith.mulf %15, %14 : vector<16x256xf32>
    %17 = arith.subf %10, %16 : vector<16x256xf32>
    %18 = arith.truncf %17 : vector<16x256xf32> to vector<16x256xbf16>
    %c0_11 = arith.constant 0 : index
    %c0_12 = arith.constant 0 : index
    %19 = vector.load %arg11[%c0_11, %c0_12] : memref<16x256xf32, #tpu.memory_space<vmem>>, vector<16x256xf32>
    %20 = arith.truncf %19 : vector<16x256xf32> to vector<16x256xbf16>
    %cst_13 = arith.constant dense<0.000000e+00> : vector<256x256xf32>
    %21 = tpu.matmul %18, %20, %cst_13 {dimension_numbers = #tpu.dot_dimension_numbers<[0], [0], [1], [1], [0, 1, 1, 1], [], []>} : vector<16x256xbf16>, vector<16x256xbf16>, vector<256x256xf32> -> vector<256x256xf32>
    %cst_14 = arith.constant dense<0xFF800000> : vector<256xf32>
    %22 = vector.multi_reduction <maximumf>, %21, %cst_14 [1] : vector<256x256xf32> to vector<256xf32>
    %23 = vector.shape_cast %22 : vector<256xf32> to vector<256x1xf32>
    %24 = vector.broadcast %23 : vector<256x1xf32> to vector<256x256xf32>
    %25 = arith.subf %21, %24 : vector<256x256xf32>
    %26 = math.exp %25 : vector<256x256xf32>
    %cst_15 = arith.constant dense<0.000000e+00> : vector<256xf32>
    %27 = vector.multi_reduction <add>, %26, %cst_15 [1] : vector<256x256xf32> to vector<256xf32>
    %28 = vector.shape_cast %27 : vector<256xf32> to vector<256x1xf32>
    %29 = tpu.reciprocal %28 {approx = true} : vector<256x1xf32> -> vector<256x1xf32>
    %30 = vector.broadcast %29 : vector<256x1xf32> to vector<256x256xf32>
    %31 = arith.mulf %26, %30 : vector<256x256xf32>
    %c0_16 = arith.constant 0 : index
    %c0_17 = arith.constant 0 : index
    %32 = vector.load %arg12[%c0_16, %c0_17] : memref<16x256xbf16, #tpu.memory_space<vmem>>, vector<16x256xbf16>
    %33 = arith.truncf %31 : vector<256x256xf32> to vector<256x256xbf16>
    %cst_18 = arith.constant dense<0.000000e+00> : vector<16x256xf32>
    %34 = tpu.matmul %32, %33, %cst_18 {dimension_numbers = #tpu.dot_dimension_numbers<[1], [1], [0], [0], [0, 0, 1, 0], [], []>} : vector<16x256xbf16>, vector<256x256xbf16>, vector<16x256xf32> -> vector<16x256xf32>
    %35 = arith.truncf %34 : vector<16x256xf32> to vector<16x256xbf16>
    %36 = arith.truncf %13 : vector<16x256xf32> to vector<16x256xbf16>
    %37 = tpu.concatenate %35, %36 in 0 : vector<16x256xbf16>, vector<16x256xbf16> -> vector<32x256xbf16>
    %c0_19 = arith.constant 0 : index
    %c0_20 = arith.constant 0 : index
    %38 = vector.load %arg8[%c0_19, %c0_20] : memref<16x32xbf16, #tpu.memory_space<vmem>>, vector<16x32xbf16>
    %cst_21 = arith.constant dense<0.000000e+00> : vector<16x256xf32>
    %39 = tpu.matmul %38, %37, %cst_21 {dimension_numbers = #tpu.dot_dimension_numbers<[1], [0], [0], [1], [0, 0, 1, 1], [], []>} : vector<16x32xbf16>, vector<32x256xbf16>, vector<16x256xf32> -> vector<16x256xf32>
    %c0_22 = arith.constant 0 : index
    %c0_23 = arith.constant 0 : index
    %40 = vector.load %arg9[%c0_22, %c0_23] : memref<16x1xf32, #tpu.memory_space<vmem>>, vector<16x1xf32>
    %41 = vector.broadcast %40 : vector<16x1xf32> to vector<16x256xf32>
    %42 = arith.addf %39, %41 : vector<16x256xf32>
    %cst_24 = arith.constant 0.000000e+00 : f32
    %43 = vector.broadcast %cst_24 : f32 to vector<16x256xf32>
    %44 = arith.maximumf %42, %43 : vector<16x256xf32>
    %c0_25 = arith.constant 0 : index
    %c0_26 = arith.constant 0 : index
    %c0_27 = arith.constant 0 : index
    %45 = vector.load %arg10[%c0_25, %c0_26, %c0_27] : memref<1x16x256xf32, #tpu.memory_space<vmem>>, vector<1x16x256xf32>
    %46 = vector.shape_cast %45 : vector<1x16x256xf32> to vector<16x256xf32>
    %47 = vector.shape_cast %44 : vector<16x256xf32> to vector<1x16x256xf32>
    tpu.vector_store %arg10[%c0_25, %c0_26, %c0_27], %47 {strides = array<i32>} : memref<1x16x256xf32, #tpu.memory_space<vmem>>, vector<1x16x256xf32>,
    return
  }
  func.func @transform_0(%arg0: i32, %arg1: i32) -> (i32, i32, i32) {
    %c0_i32 = arith.constant 0 : i32
    %c0_i32_0 = arith.constant 0 : i32
    %c0_i32_1 = arith.constant 0 : i32
    return %arg0, %c0_i32, %c0_i32_0 : i32, i32, i32
  }
  func.func @transform_1(%arg0: i32, %arg1: i32) -> (i32, i32, i32) {
    %c0_i32 = arith.constant 0 : i32
    %c0_i32_0 = arith.constant 0 : i32
    return %arg0, %c0_i32, %arg1 : i32, i32, i32
  }
  func.func @transform_2(%arg0: i32, %arg1: i32) -> (i32, i32) {
    %c0_i32 = arith.constant 0 : i32
    %c0_i32_0 = arith.constant 0 : i32
    %c0_i32_1 = arith.constant 0 : i32
    return %c0_i32, %c0_i32_0 : i32, i32
  }
  func.func @transform_3(%arg0: i32, %arg1: i32) -> (i32, i32) {
    %c0_i32 = arith.constant 0 : i32
    %c0_i32_0 = arith.constant 0 : i32
    %c0_i32_1 = arith.constant 0 : i32
    return %c0_i32, %c0_i32_0 : i32, i32
  }
  func.func @transform_4(%arg0: i32, %arg1: i32) -> (i32, i32) {
    %c0_i32 = arith.constant 0 : i32
    %c0_i32_0 = arith.constant 0 : i32
    %c0_i32_1 = arith.constant 0 : i32
    return %c0_i32, %c0_i32_0 : i32, i32
  }
  func.func @transform_5(%arg0: i32, %arg1: i32) -> (i32, i32) {
    %c0_i32 = arith.constant 0 : i32
    %c0_i32_0 = arith.constant 0 : i32
    %c0_i32_1 = arith.constant 0 : i32
    return %c0_i32, %c0_i32_0 : i32, i32
  }
  func.func @transform_6(%arg0: i32, %arg1: i32) -> (i32, i32) {
    %c0_i32 = arith.constant 0 : i32
    %c0_i32_0 = arith.constant 0 : i32
    %c0_i32_1 = arith.constant 0 : i32
    return %c0_i32, %c0_i32_0 : i32, i32
  }
  func.func @transform_7(%arg0: i32, %arg1: i32) -> (i32, i32) {
    %c0_i32 = arith.constant 0 : i32
    %c0_i32_0 = arith.constant 0 : i32
    %c0_i32_1 = arith.constant 0 : i32
    return %c0_i32, %c0_i32_0 : i32, i32
  }
  func.func @transform_8(%arg0: i32, %arg1: i32) -> (i32, i32, i32) {
    %c0_i32 = arith.constant 0 : i32
    %c0_i32_0 = arith.constant 0 : i32
    return %arg0, %c0_i32, %arg1 : i32, i32, i32
  }
}

</mosaic_0001>

<bundles_post_ra>
// kernel: tpu_custom_call.1
= control target key start
LH: loop header
LB: loop body
LE: loop exit
PB: predicated region body
PF: predicated region fallthrough
CT: control target
= control target key end

     0   :  { %s3638_s0 = inlined_call_operand.hbm [shape: bf16[2,16,256], index: 0, kind: input, shape index: {}]   ;;  %s3639_s1 = inlined_call_operand.hbm [shape: bf16[2,16,256], index: 1, kind: input, shape index: {}]   ;;  %s3640_s2 = inlined_call_operand.hbm [shape: bf16[32,16], index: 2, kind: input, shape index: {}]   ;;  %s3641_s3 = inlined_call_operand.hbm [shape: f32[32,1], index: 3, kind: input, shape index: {}]   ;;  %s3642_s4 = inlined_call_operand.hbm [shape: bf16[32,16], index: 4, kind: input, shape index: {}]   ;;  %s3643_s5 = inlined_call_operand.hbm [shape: f32[32,1], index: 5, kind: input, shape index: {}]   ;;  %s3644_s6 = inlined_call_operand.hbm [shape: bf16[16,32], index: 6, kind: input, shape index: {}]   ;;  %s3645_s7 = inlined_call_operand.hbm [shape: f32[16,1], index: 7, kind: input, shape index: {}]   ;;  %s3646_s8 = inlined_call_operand.hbm [shape: f32[2,16,256], index: 8, kind: output, shape index: {}]  }
   0x1   :  { %3689 = sst [smem:[#allocation46_spill]] %s3640_s2 }
   0x2   :  { %3690 = sst [smem:[#allocation47_spill]] %s3641_s3 }
   0x3   :  { %3691 = sst [smem:[#allocation48_spill]] %s3642_s4 }
   0x4   :  { %3692 = sst [smem:[#allocation49_spill]] %s3643_s5 }
   0x5   :  { %3693 = sst [smem:[#allocation50_spill]] %s3644_s6 }
   0x6   :  { %3694 = sst [smem:[#allocation51_spill]] %s3645_s7 }
   0x7   :  { %3695 = sst [smem:[#allocation52_spill]] %s3646_s8 }
   0x8   :  { %13 = vsyncpa [#allocation5], 0 }
   0x9   :  { %15 = vsyncpa [#allocation5 + $0x1], 0 }
   0xa   :  { %16 = vsyncpa [#allocation8], 0 }
   0xb   :  { %18 = vsyncpa [#allocation8 + $0x1], 0 }
   0xc   :  { %19 = vsyncpa [#allocation11], 0 }
   0xd   :  { %20 = vsyncpa [#allocation14], 0 }
   0xe   :  { %21 = vsyncpa [#allocation17], 0 }
   0xf   :  { %22 = vsyncpa [#allocation6], 0 }
  0x10   :  { %24 = vsyncpa [#allocation6 + $0x1], 0  ;;  %s2616_s27 = smov 0   ;;  %s2618_s28 = smov 0  }
  0x11   :  { %s2620_s29 = smov 0   ;;  %s2622_s30 = smov 0  }
  0x12   :  { %s2624_s9 = smov 0   ;;  %s2626_s10 = smov 0  }
  0x13 LB: > { %3696 = sst [smem:[#allocation26_spill]] %s2549_s9  ;;  %s2647_s11 = sadd.s32 4294967295, %s2553_s10   ;;  %s2553_s10 = sphi %s2626_s10, %s30_s10   ;;  %s2549_s9 = sphi %s2624_s9, %s3802_s9   ;;  %s2545_s30 = sphi %s2622_s30, %s3801_s30   ;;  %s2541_s29 = sphi %s2620_s29, %s3805_s29   ;;  %s2537_s28 = sphi %s2618_s28, %s3804_s28   ;;  %s2533_s27 = sphi %s2616_s27, %s3803_s27  }
  0x14   : > { %p1821_p0 = scmp.ge.s32.totalorder %s2553_s10, 1  ;;  %p3652_p1 = scmp.eq.s32.totalorder %s2647_s11, 0 }
  0x15   : > { %p255_p2 = scmp.lt.s32.totalorder %s2553_s10, 3  ;;  %s2555_s13 = smov [#allocation9]  }
  0x16   : > { %s267_s14 = sshll.u32 %s2555_s13, 4  ;;  %s2556_s16 = smov [#allocation10]   ;;  %s2656_s14 = int_to_ptr.vmem [resolvable:$true] %s267_s14 }
  0x17   : > { %p2652_p3 = pnand %p1821_p0, %p255_p2  ;;  %s280_s17 = sshll.u32 %s2556_s16, 4  ;;  %s2667_s17 = int_to_ptr.vmem [resolvable:$true] %s280_s17 }
  0x18   : > { %s3699_s2 = sld [smem:[#allocation46_spill]] }
  0x19   : > { %s3697_s12 = scalar_select %p2652_p3, 1, 0 }
  0x1a   : > { %p1913_p4 = pneg %p2652_p3 }
  0x1c   : > { %p2663_p6 = pnand %p1913_p4, %p3652_p1 }
  0x1e   : > { %s2223_s20 = scalar_lea.hbm %s3699_s2, 256  ;;  %p2677_p8 = pneg %p2663_p6 }
  0x1f   : > { %p2224_p7 = scmp.ne.s32.totalorder %s3699_s2, %s2223_s20  ;;  %p2230_p11 = scmp.lt.u32.totalorder %s2223_s20, %s3699_s2 }
  0x21   : > { %p2226_p9 = pnand %p2677_p8, %p2224_p7 }
  0x23   : > { %p2227_p10 = pneg %p2226_p9 }
  0x25   : > { %p2232_p12 = pnand %p2230_p11, %p2227_p10 }
  0x27   : > { %2235 = shalt.err (!%p2232_p12)
}
  0x28   : > { %s2236_s26 = scalar_lea.vmem %s2656_s14, 256  ;;  %p2244_p4 = scmp.lt.s32.totalorder %s2656_s14, %s2656_s14 }
  0x29   : > { %p2237_p13 = scmp.ne.s32.totalorder %s2656_s14, %s2236_s26  ;;  %p2245_p5 = scmp.lt.s32.totalorder %s2236_s26, %s2236_s26 }
  0x2b   : > { %p2239_p0 = pnand %p2237_p13, %p2677_p8  ;;  %p2246_p7 = por %p2245_p5, %p2244_p4 }
  0x2d   : > { %p2240_p2 = pneg %p2239_p0 }
  0x2f   : > { %p2247_p9 = pnand %p2246_p7, %p2240_p2 }
  0x31   : > { %2250 = shalt.err (!%p2247_p9)
}
  0x32   : > { %s3648_s13 = smov 64   ;;  %s3650_s16 = smov 4  }
  0x33   : > { %1916 = dma.hbm_to_vmem [thread:$0]  (!%p2663_p6), %s3699_s2, 256, %s2656_s14, [#allocation8], %s3648_s13, %s3648_s13, %s3650_s16  }
  0x34   : > { %s3701_s3 = sld [smem:[#allocation47_spill]] }
  0x3a   : > { %s2251_s22 = scalar_lea.hbm %s3701_s3, 512 }
  0x3b   : > { %p2252_p5 = scmp.ne.s32.totalorder %s3701_s3, %s2251_s22  ;;  %p2258_p12 = scmp.lt.u32.totalorder %s2251_s22, %s3701_s3 }
  0x3d   : > { %p2254_p10 = pnand %p2252_p5, %p2677_p8 }
  0x3f   : > { %p2255_p11 = pneg %p2254_p10 }
  0x41   : > { %p2260_p13 = pnand %p2258_p12, %p2255_p11 }
  0x43   : > { %2263 = shalt.err (!%p2260_p13)
}
  0x44   : > { %s2264_s14 = scalar_lea.vmem %s2667_s17, 512  ;;  %p2272_p7 = scmp.lt.s32.totalorder %s2667_s17, %s2667_s17 }
  0x45   : > { %p2265_p0 = scmp.ne.s32.totalorder %s2667_s17, %s2264_s14  ;;  %p2273_p9 = scmp.lt.s32.totalorder %s2264_s14, %s2264_s14 }
  0x47   : > { %p2267_p2 = pnand %p2265_p0, %p2677_p8  ;;  %p2274_p5 = por %p2273_p9, %p2272_p7 }
  0x49   : > { %p2268_p4 = pneg %p2267_p2 }
  0x4b   : > { %p2275_p10 = pnand %p2274_p5, %p2268_p4 }
  0x4d   : > { %2278 = shalt.err (!%p2275_p10)
}
  0x4e   : > { %s3654_s18 = smov 128   ;;  %s3656_s8 = smov 8  }
  0x4f   : > { %1919 = dma.hbm_to_vmem [thread:$0]  (!%p2663_p6), %s3701_s3, 512, %s2667_s17, [#allocation11], %s3654_s18, %s3654_s18, %s3656_s8  }
  0x50   : > { %s2561_s21 = smov [#allocation13]   ;;  %s2562_s24 = smov [#allocation12]  }
  0x51   : > { %s306_s22 = sshll.u32 %s2561_s21, 4  ;;  %s293_s25 = sshll.u32 %s2562_s24, 4  ;;  %s307_s22 = int_to_ptr.vmem [resolvable:$true] %s306_s22  ;;  %s2727_s25 = int_to_ptr.vmem [resolvable:$true] %s293_s25 }
  0x52   : > { %s3702_s5 = sld [smem:[#allocation49_spill]] }
  0x58   : > { %s2279_s13 = scalar_lea.hbm %s3702_s5, 512 }
  0x59   : > { %p2280_p11 = scmp.ne.s32.totalorder %s3702_s5, %s2279_s13  ;;  %p2286_p0 = scmp.lt.u32.totalorder %s2279_s13, %s3702_s5 }
  0x5b   : > { %p2282_p12 = pnand %p2280_p11, %p2677_p8 }
  0x5d   : > { %p2283_p13 = pneg %p2282_p12 }
  0x5f   : > { %p2288_p2 = pnand %p2286_p0, %p2283_p13 }
  0x61   : > { %2291 = shalt.err (!%p2288_p2)
}
  0x62   : > { %s2292_s20 = scalar_lea.vmem %s307_s22, 512  ;;  %p2300_p5 = scmp.lt.s32.totalorder %s307_s22, %s307_s22 }
  0x63   : > { %p2293_p4 = scmp.ne.s32.totalorder %s307_s22, %s2292_s20  ;;  %p2301_p10 = scmp.lt.s32.totalorder %s2292_s20, %s2292_s20 }
  0x65   : > { %p2295_p7 = pnand %p2293_p4, %p2677_p8  ;;  %p2302_p1 = por %p2301_p10, %p2300_p5 }
  0x67   : > { %p2296_p9 = pneg %p2295_p7 }
  0x69   : > { %p2303_p3 = pnand %p2302_p1, %p2296_p9 }
  0x6b   : > { %2306 = shalt.err (!%p2303_p3)
}
  0x6c   : > { %1925 = dma.hbm_to_vmem [thread:$0]  (!%p2663_p6), %s3702_s5, 512, %s307_s22, [#allocation14], %s3654_s18, %s3654_s18, %s3656_s8  }
  0x6d   : > { %s3703_s4 = sld [smem:[#allocation48_spill]] }
  0x73   : > { %s2307_s24 = scalar_lea.hbm %s3703_s4, 256 }
  0x74   : > { %p2308_p11 = scmp.ne.s32.totalorder %s3703_s4, %s2307_s24  ;;  %p2314_p12 = scmp.lt.u32.totalorder %s2307_s24, %s3703_s4 }
  0x76   : > { %p2310_p1 = pnand %p2308_p11, %p2677_p8 }
  0x78   : > { %p2311_p3 = pneg %p2310_p1 }
  0x7a   : > { %p2316_p13 = pnand %p2314_p12, %p2311_p3 }
  0x7c   : > { %2319 = shalt.err (!%p2316_p13)
}
  0x7d   : > { %s2320_s22 = scalar_lea.vmem %s2727_s25, 256  ;;  %p2328_p7 = scmp.lt.s32.totalorder %s2727_s25, %s2727_s25 }
  0x7e   : > { %p2321_p0 = scmp.ne.s32.totalorder %s2727_s25, %s2320_s22  ;;  %p2329_p9 = scmp.lt.s32.totalorder %s2320_s22, %s2320_s22 }
  0x80   : > { %p2323_p2 = pnand %p2321_p0, %p2677_p8  ;;  %p2330_p5 = por %p2329_p9, %p2328_p7 }
  0x82   : > { %p2324_p4 = pneg %p2323_p2 }
  0x84   : > { %p2331_p10 = pnand %p2330_p5, %p2324_p4 }
  0x86   : > { %2334 = shalt.err (!%p2331_p10)
}
  0x87   : > { %s3704_s20 = smov 4   ;;  %s3705_s2 = smov 64  }
  0x88   : > { %1922 = dma.hbm_to_vmem [thread:$0]  (!%p2663_p6), %s3703_s4, 256, %s2727_s25, [#allocation11], %s3705_s2, %s3705_s2, %s3704_s20  }
  0x89   : > { %s2563_s21 = smov [#allocation15]   ;;  %s2564_s26 = smov [#allocation16]  }
  0x8a   : > { %s319_s24 = sshll.u32 %s2563_s21, 4  ;;  %s332_s14 = sshll.u32 %s2564_s26, 4  ;;  %s320_s24 = int_to_ptr.vmem [resolvable:$true] %s319_s24  ;;  %s2776_s14 = int_to_ptr.vmem [resolvable:$true] %s332_s14 }
  0x8b   : > { %s3706_s6 = sld [smem:[#allocation50_spill]] }
  0x91   : > { %s2335_s22 = scalar_lea.hbm %s3706_s6, 128 }
  0x92   : > { %p2336_p11 = scmp.ne.s32.totalorder %s3706_s6, %s2335_s22  ;;  %p2342_p12 = scmp.lt.u32.totalorder %s2335_s22, %s3706_s6 }
  0x94   : > { %p2338_p1 = pnand %p2336_p11, %p2677_p8 }
  0x96   : > { %p2339_p3 = pneg %p2338_p1 }
  0x98   : > { %p2344_p13 = pnand %p2342_p12, %p2339_p3 }
  0x9a   : > { %2347 = shalt.err (!%p2344_p13)
}
  0x9b   : > { %s2348_s16 = scalar_lea.vmem %s320_s24, 128  ;;  %p2356_p7 = scmp.lt.s32.totalorder %s320_s24, %s320_s24 }
  0x9c   : > { %p2349_p0 = scmp.ne.s32.totalorder %s320_s24, %s2348_s16  ;;  %p2357_p9 = scmp.lt.s32.totalorder %s2348_s16, %s2348_s16 }
  0x9e   : > { %p2351_p2 = pnand %p2349_p0, %p2677_p8  ;;  %p2358_p5 = por %p2357_p9, %p2356_p7 }
  0xa0   : > { %p2352_p4 = pneg %p2351_p2 }
  0xa2   : > { %p2359_p10 = pnand %p2358_p5, %p2352_p4 }
  0xa4   : > { %2362 = shalt.err (!%p2359_p10)
}
  0xa5   : > { %1928 = dma.hbm_to_vmem [thread:$0]  (!%p2663_p6), %s3706_s6, 128, %s320_s24, [#allocation14], %s3705_s2, %s3705_s2, %s3704_s20  }
  0xa6   : > { %s3707_s7 = sld [smem:[#allocation51_spill]] }
  0xac   : > { %s2363_s19 = scalar_lea.hbm %s3707_s7, 256 }
  0xad   : > { %p2364_p11 = scmp.ne.s32.totalorder %s3707_s7, %s2363_s19  ;;  %p2370_p12 = scmp.lt.u32.totalorder %s2363_s19, %s3707_s7 }
  0xaf   : > { %p2366_p1 = pnand %p2364_p11, %p2677_p8 }
  0xb1   : > { %p2367_p3 = pneg %p2366_p1 }
  0xb3   : > { %p2372_p13 = pnand %p2370_p12, %p2367_p3 }
  0xb5   : > { %2375 = shalt.err (!%p2372_p13)
}
  0xb6   : > { %s2376_s20 = scalar_lea.vmem %s2776_s14, 256  ;;  %p2384_p7 = scmp.lt.s32.totalorder %s2776_s14, %s2776_s14 }
  0xb7   : > { %p2377_p0 = scmp.ne.s32.totalorder %s2776_s14, %s2376_s20  ;;  %p2385_p9 = scmp.lt.s32.totalorder %s2376_s20, %s2376_s20 }
  0xb9   : > { %p2379_p2 = pnand %p2377_p0, %p2677_p8  ;;  %p2386_p5 = por %p2385_p9, %p2384_p7 }
  0xbb   : > { %p2380_p4 = pneg %p2379_p2 }
  0xbd   : > { %p2387_p10 = pnand %p2386_p5, %p2380_p4 }
  0xbf   : > { %2390 = shalt.err (!%p2387_p10)
}
  0xc0   : > { %s3708_s2 = smov 8   ;;  %s3709_s24 = smov 128  }
  0xc1   : > { %1931 = dma.hbm_to_vmem [thread:$0]  (!%p2663_p6), %s3707_s7, 256, %s2776_s14, [#allocation17], %s3709_s24, %s3709_s24, %s3708_s2  }
  0xc2   : > { %s1820_s15 = sadd.s32 4294967294, %s2553_s10   ;;  %s42_s23 = sadd.s32 1, %s2549_s9 }
  0xc3   : > { %p44_p8 = scmp.ge.s32.totalorder %s42_s23, 2  ;;  %s49_s8 = sadd.s32 1, %s2541_s29 }
  0xc4   : > { %p56_p11 = scmp.ne.s32.totalorder %s2541_s29, %s2537_s28  ;;  %p57_p1 = scmp.eq.s32.totalorder %s2553_s10, 0 }
  0xc5   : > { %s3807_s23 = smov (%p44_p8, %s42_s23), 0  ;;  %p62_p12 = scmp.ne.s32.totalorder %s2537_s28, %s2533_s27 }
  0xc6   : > { %3710 = sst [smem:[#allocation27_spill]] %s3807_s23  ;;  %p2833_p3 = por %p57_p1, %p56_p11 }
  0xc7   : > { %s46_s14 = ssub.s32 %s2549_s9, %s3807_s23  ;;  %p242_p6 = scmp.eq.s32.totalorder %s2647_s11, 1 }
  0xc8   : > { %p47_p13 = scmp.eq.s32.totalorder %s46_s14, 0  ;;  %p3712_p0 = scmp.eq.s32.totalorder %s2647_s11, 0 }
  0xc9   : > { %p2848_p4 = por %p242_p6, %p56_p11  ;;  %p248_p7 = scmp.eq.s32.totalorder %s1820_s15, 1 }
  0xca   : > { %p2844_p2 = por %p3712_p0, %p62_p12  ;;  %p1949_p5 = scmp.lt.s32.totalorder %s2553_s10, 2 }
  0xcb   : > { %s3714_s19 = scalar_select %p2848_p4, 1, 0 }
  0xcc   : > { %s2853_s17 = scalar_select %p47_p13, %s2541_s29, %s49_s8  }
  0xcd   : > { %p2855_p9 = por %p248_p7, %p62_p12  ;;  %s346_s13 = sand.u32 1, %s2541_s29  }
  0xce   : > { %s1880_s25 = sshll.u32 %s2549_s9, 8  ;;  %s2862_s20 = sshll.u32 %s346_s13, 4 }
  0xcf   : > { %s3715_s22 = scalar_select %p2855_p9, 1, 0 }
  0xd0   : > { %s2867_s14 = scalar_lea.hbm %s3638_s0, %s1880_s25  ;;  %s350_s15 = scalar_lea.vmem [#allocation4], %s2862_s20 }
  0xd1   : > { %s357_s8 = sshll.u32 %s350_s15, 4  ;;  %p2872_p10 = pnand %p1949_p5, %p2833_p3  ;;  %s2876_s8 = int_to_ptr.vmem [resolvable:$true] %s357_s8 }
  0xd2   : > { %s2881_s18 = scalar_lea.hbm %s3639_s1, %s1880_s25  ;;  %s2883_s5 = scalar_lea.sflag [#allocation5], %s346_s13 }
  0xd3   : > { %s2391_s6 = scalar_lea.hbm %s2867_s14, 256  ;;  %p2393_p11 = pneg %p2872_p10 }
  0xd4   : > { %p2392_p8 = scmp.ne.s32.totalorder %s2867_s14, %s2391_s6  ;;  %s2396_s7 = scalar_lea.hbm %s3638_s0, 512 }
  0xd5   : > { %p2397_p12 = scmp.lt.u32.totalorder %s2867_s14, %s3638_s0  ;;  %p2398_p6 = scmp.lt.u32.totalorder %s2396_s7, %s2391_s6 }
  0xd6   : > { %p2394_p1 = pnand %p2393_p11, %p2392_p8  ;;  %p2400_p0 = scmp.lt.u32.totalorder %s2391_s6, %s2867_s14 }
  0xd7   : > { %p2399_p13 = por %p2398_p6, %p2397_p12 }
  0xd8   : > { %p2395_p3 = pneg %p2394_p1 }
  0xd9   : > { %p2401_p7 = por %p2400_p0, %p2399_p13 }
  0xdb   : > { %p2402_p5 = pnand %p2401_p7, %p2395_p3 }
  0xdd   : > { %2405 = shalt.err (!%p2402_p5)
}
  0xde   : > { %s2406_s4 = scalar_lea.vmem %s2876_s8, 256  ;;  %s2565_s13 = smov [#allocation4]  }
  0xdf   : > { %p2407_p8 = scmp.ne.s32.totalorder %s2876_s8, %s2406_s4  ;;  %s2411_s25 = sshll.u32 %s2565_s13, 4  ;;  %s2412_s25 = int_to_ptr.vmem [resolvable:$false] %s2411_s25 }
  0xe0   : > { %s2413_s9 = scalar_lea.vmem %s2412_s25, 512  ;;  %p2414_p4 = scmp.lt.s32.totalorder %s2876_s8, %s2412_s25 }
  0xe1   : > { %p2409_p1 = pnand %p2407_p8, %p2393_p11  ;;  %p2415_p12 = scmp.lt.s32.totalorder %s2413_s9, %s2406_s4 }
  0xe3   : > { %p2410_p9 = pneg %p2409_p1  ;;  %p2416_p6 = por %p2415_p12, %p2414_p4 }
  0xe5   : > { %p2417_p13 = pnand %p2416_p6, %p2410_p9 }
  0xe7   : > { %2420 = shalt.err (!%p2417_p13)
}
  0xe8   : > { %1935 = dma.hbm_to_vmem [thread:$0]  (!%p2872_p10), %s2867_s14, 256, %s2876_s8, %s2883_s5, %s3709_s24, %s3709_s24, %s3708_s2  }
  0xe9   : > { %s371_s6 = scalar_lea.vmem [#allocation7], %s2862_s20  ;;  %s367_s23 = sand.u32 1, %s2553_s10  }
  0xea   : > { %s380_s7 = sshll.u32 %s371_s6, 4  ;;  %s2918_s16 = scalar_lea.sflag [#allocation8], %s367_s23  ;;  %s2916_s7 = int_to_ptr.vmem [resolvable:$true] %s380_s7 }
  0xeb   : > { %s2421_s21 = scalar_lea.hbm %s2881_s18, 256  ;;  %s2426_s13 = scalar_lea.hbm %s3639_s1, 512 }
  0xec   : > { %p2422_p4 = scmp.ne.s32.totalorder %s2881_s18, %s2421_s21  ;;  %p2427_p0 = scmp.lt.u32.totalorder %s2881_s18, %s3639_s1 }
  0xed   : > { %p2428_p7 = scmp.lt.u32.totalorder %s2426_s13, %s2421_s21  ;;  %p2430_p8 = scmp.lt.u32.totalorder %s2421_s21, %s2881_s18 }
  0xee   : > { %p2424_p9 = pnand %p2422_p4, %p2393_p11 }
  0xef   : > { %p2429_p5 = por %p2428_p7, %p2427_p0 }
  0xf0   : > { %p2425_p3 = pneg %p2424_p9 }
  0xf1   : > { %p2431_p1 = por %p2430_p8, %p2429_p5 }
  0xf3   : > { %p2432_p12 = pnand %p2431_p1, %p2425_p3 }
  0xf5   : > { %2435 = shalt.err (!%p2432_p12)
}
  0xf6   : > { %s2436_s5 = scalar_lea.vmem %s2916_s7, 256  ;;  %s2566_s20 = smov [#allocation7]  }
  0xf7   : > { %p2437_p6 = scmp.ne.s32.totalorder %s2916_s7, %s2436_s5  ;;  %s2441_s14 = sshll.u32 %s2566_s20, 4  ;;  %s2442_s14 = int_to_ptr.vmem [resolvable:$false] %s2441_s14 }
  0xf8   : > { %s2443_s8 = scalar_lea.vmem %s2442_s14, 512  ;;  %p2444_p9 = scmp.lt.s32.totalorder %s2916_s7, %s2442_s14 }
  0xf9   : > { %p2439_p13 = pnand %p2437_p6, %p2393_p11  ;;  %p2445_p0 = scmp.lt.s32.totalorder %s2443_s8, %s2436_s5 }
  0xfb   : > { %p2440_p4 = pneg %p2439_p13  ;;  %p2446_p7 = por %p2445_p0, %p2444_p9 }
  0xfd   : > { %p2447_p5 = pnand %p2446_p7, %p2440_p4 }
  0xff   : > { %2450 = shalt.err (!%p2447_p5)
}
 0x100   : > { %1938 = dma.hbm_to_vmem [thread:$0]  (!%p2872_p10), %s2881_s18, 256, %s2916_s7, %s2918_s16, %s3709_s24, %s3709_s24, %s3708_s2  }
 0x101   : > { %p3717_p11 = scmp.ne.s32.totalorder %s3697_s12, 0 }
 0x103   : > { %392 = sbr.rel (%p3717_p11) target bundleno = 1810 (0x712), region = 52 }
 0x10a   : > { %s2950_s6 = sand.u32 1, %s2537_s28  }
 0x10b   : > { %s1836_s23 = sshll.u32 %s2950_s6, 4  ;;  %s395_s21 = scalar_lea.sflag [#allocation5], %s2950_s6 }
 0x10c   : > { %s398_s15 = scalar_lea.vmem [#allocation4], %s1836_s23 }
 0x10d   : > { %2504 = dma.done.wait (%p2844_p2), %s395_s21, 256  }
 0x10e   : > { %2506 = vsyncadd (%p2844_p2), %s395_s21, 4294967040  ;;  %s403_s3 = sand.u32 1, %s2647_s11   ;;  %s407_s12 = scalar_lea.vmem [#allocation7], %s1836_s23 }
 0x10f   : > { %s404_s2 = scalar_lea.sflag [#allocation8], %s403_s3 }
 0x110   : > { %2508 = dma.done.wait (%p2844_p2), %s404_s2, 256  }
 0x111   : > { %2510 = vsyncadd (%p2844_p2), %s404_s2, 4294967040  ;;  %p3718_p10 = scmp.eq.s32.totalorder %s2647_s11, 0 }
 0x113   : > { %2512 = dma.done.wait (%p3718_p10), [#allocation8], 256   ;;  %p3719_p3 = pmov %p3718_p10 }
 0x115   : > { %2514 = vsyncadd (%p3719_p3), [#allocation8], 4294967040  ;;  %p3720_p8 = pmov %p3719_p3 }
 0x116   : > { %p3721_p1 = pmov %p3719_p3 }
 0x117   : > { %2516 = dma.done.wait (%p3720_p8), [#allocation11], 768  }
 0x118   : > { %2518 = vsyncadd (%p3721_p1), [#allocation11], 4294966528  ;;  %p3722_p12 = pmov %p3721_p1 }
 0x119   : > { %p3723_p6 = pmov %p3721_p1 }
 0x11a   : > { %2520 = dma.done.wait (%p3722_p12), [#allocation14], 640  }
 0x11b   : > { %2522 = vsyncadd (%p3723_p6), [#allocation14], 4294966656  ;;  %p3724_p2 = pmov %p3721_p1 }
 0x11c   : > { %p3725_p13 = pmov %p3721_p1 }
 0x11d   : > { %2524 = dma.done.wait (%p3724_p2), [#allocation17], 256  }
 0x11e   : > { %2526 = vsyncadd (%p3725_p13), [#allocation17], 4294967040  ;;  %v3661_v0 = vmov 0   ;;  %v2020_v1 = vld [vmem:[%s398_s15 + $0x4] ss:$8 sps:$4 sm:$0xff]   ;;  %vm526_vm0 = vcmask 130048  }
 0x11f   : > { %565 = vmatprep.mubr.bf16.mxu0 %v3661_v0  ;;  %687 = vmatprep.mubr.bf16.mxu1 %v3661_v0  ;;  %v2022_v2 = vld [vmem:[%s407_s12 + $0x4] ss:$8 sps:$4 sm:$0xff]   ;;  %v2024_v3 = vld [vmem:[%s398_s15] ss:$8 sps:$4 sm:$0xff]   ;;  %vm1581_vm1 = vcmask 261120   ;;  %s1844_s11 = sshll.u32 %s2950_s6, 5 }
 0x120   : > { %2018 = vset.pattern.permute.xlu0 %v3661_v0  ;;  %2019 = vset.pattern.permute.xlu1 %v3661_v0  ;;  %v2025_v4 = vld [vmem:[%s407_s12] ss:$8 sps:$4 sm:$0xff]   ;;  %s468_s24 = scalar_lea.vmem [#allocation18], %s1844_s11  ;;  %s1882_s18 = sshll.u32 %s2545_s30, 9 }
 0x121   : > { %533 = vmatprep.subr.bf16.mxu0 %v2020_v1  ;;  %655 = vmatprep.subr.bf16.mxu1 %v2022_v2  ;;  %v2026_v5 = vld [vmem:[#allocation12] sm:$0xff]   ;;  %v2027_v6 = vld [vmem:[#allocation9] sm:$0xff]   ;;  %v483_v9 = vld [vmem:[#allocation13 + $0x8] sm:$0xff]  ;;  %s1652_s26 = sshll.u32 %s468_s24, 4  ;;  %s3797_s4 = sld [smem:[#allocation52_spill]]  ;;  %s3584_s26 = int_to_ptr.vmem [resolvable:$true] %s1652_s26 }
 0x122   : > { %534 = vmatpush1.bf16.msra.mxu0 %v2024_v3  ;;  %656 = vmatpush1.bf16.msra.mxu1 %v2025_v4  ;;  %v482_v7 = vld [vmem:[#allocation13] sm:$0xff]  ;;  %v604_v8 = vld [vmem:[#allocation10] sm:$0xff]  ;;  %v605_v10 = vld [vmem:[#allocation10 + $0x8] sm:$0xff]  ;;  %s1637_s30 = scalar_lea.sflag [#allocation6], %s2950_s6  ;;  %s2451_s25 = scalar_lea.vmem %s3584_s26, 512 }
 0x123   : > { %488 = vperm.xlu0 %2018, %v482_v7   ;;  %610 = vperm.xlu1 %2019, %v604_v8   ;;  %v2028_v11 = vld [vmem:[#allocation12 + $0x8] sm:$0xff]   ;;  %p2452_p4 = scmp.ne.s32.totalorder %s3584_s26, %s2451_s25  ;;  %p3798_p9 = scmp.ne.s32.totalorder %s3714_s19, 0 }
 0x124   : > { %s2568_s9 = smov [#allocation18]  }
 0x125   : > { %1849 = vmatmul.mubr.msk.bf16.vlgmr.msra.gmra.mrb[0].mxu0 %vm526_vm0, %v2026_v5  ;;  %1855 = vmatmul.mubr.msk.bf16.vlgmr.msra.gmra.mrb[0].mxu1 %vm526_vm0, %v2027_v6  ;;  %p2453_p0 = pnand %p2452_p4, %p3798_p9  ;;  %s2455_s5 = sshll.u32 %s2568_s9, 4  ;;  %s2456_s5 = int_to_ptr.vmem [resolvable:$false] %s2455_s5 }
 0x126   : > { %575 = vmatprep.mubr.bf16.mxu0 %v3661_v0  ;;  %697 = vmatprep.mubr.bf16.mxu1 %v3661_v0  ;;  %s2457_s20 = scalar_lea.vmem %s2456_s5, 1024  ;;  %p2458_p5 = scmp.lt.s32.totalorder %s3584_s26, %s2456_s5 }
 0x127   : > { %493 = vperm.xlu0 %2018, %v483_v9   ;;  %615 = vperm.xlu1 %2019, %v605_v10   ;;  %s3589_s13 = scalar_lea.hbm %s3797_s4, %s1882_s18  ;;  %p2454_p7 = pneg %p2453_p0 }
 0x128   : > { %p2459_p11 = scmp.lt.s32.totalorder %s2457_s20, %s2451_s25 }
 0x12a   : > { %p2460_p10 = por %p2459_p11, %p2458_p5 }
 0x12c   : > { %p2461_p3 = pnand %p2460_p10, %p2454_p7 }
 0x12d   : > { %1850 = vmatmul.mubr.msk.bf16.gmra.mrb[4].mxu0 %vm526_vm0, %v2028_v11 }
 0x12e   : > { %840 = vmatprep.mubr.bf16.mxu0 %v3661_v0 }
 0x1a2   : > { %v489_v12 = vpop.permute.xlu0 %488  ;;  %v611_v13 = vpop.permute.xlu1 %610 }
 0x1a6   : > { %v494_v14 = vpop.permute.xlu0 %493  ;;  %v616_v28 = vpop.permute.xlu1 %615 }
 0x1f8   : > { %v567_v15 = vpop.f32.mrb[0].mxu0  ;;  %v689_v16 = vpop.f32.mrb[0].mxu1 }
 0x1f9   : > { %v568_v17 = vadd.f32 %v567_v15, %v489_v12  ;;  %v569_v18 = vpop.f32.mrb[1].mxu0  ;;  %v691_v19 = vpop.f32.mrb[1].mxu1  ;;  %v690_v24 = vadd.f32 %v689_v16, %v611_v13 }
 0x1fa   : > { %v570_v20 = vadd.f32 %v569_v18, %v489_v12  ;;  %v571_v21 = vpop.f32.mrb[2].mxu0  ;;  %v693_v22 = vpop.f32.mrb[2].mxu1  ;;  %v692_v30 = vadd.f32 %v691_v19, %v611_v13 }
 0x1fb   : > { %v716_v23 = vmul.f32 0.1, %v568_v17  ;;  %v572_v25 = vadd.f32 %v571_v21, %v494_v14  ;;  %v573_v26 = vpop.f32.mrb[3].mxu0  ;;  %v695_v27 = vpop.f32.mrb[3].mxu1  ;;  %v694_v35 = vadd.f32 %v693_v22, %v616_v28 }
 0x1fc   : > { %v717_v29 = vmul.f32 0.1, %v570_v20  ;;  %v574_v31 = vadd.f32 %v573_v26, %v494_v14  ;;  %v696_v39 = vadd.f32 %v695_v27, %v616_v28 }
 0x1fd   : > { %v720_v32 = vsub.f32 %v690_v24, %v716_v23  ;;  %v718_v33 = vmul.f32 0.1, %v572_v25  ;;  %v726_v34 = vpack.c.bf16 %v572_v25, %v568_v17 }
 0x1fe   : > { %v721_v36 = vsub.f32 %v692_v30, %v717_v29  ;;  %v719_v37 = vmul.f32 0.1, %v574_v31  ;;  %v727_v38 = vpack.c.bf16 %v574_v31, %v570_v20 }
 0x1ff   : > { %v722_v40 = vsub.f32 %v694_v35, %v718_v33 }
 0x200   : > { %v723_v41 = vsub.f32 %v696_v39, %v719_v37  ;;  %808 = vmatprep.subr.bf16.mxu0 %v727_v38  ;;  %v2989_v44 = vpop.f32.mrb[4].mxu0 }
 0x201   : > { %809 = vmatpush1.bf16.msra.mxu0 %v726_v34  ;;  %v724_v42 = vpack.c.bf16 %v722_v40, %v720_v32  ;;  %3726 = vst [vmem:[#allocation28_spill] sm:$0xff] %v2989_v44  ;;  %v2991_v45 = vpop.f32.mrb[5].mxu0 }
 0x202   : > { %v725_v43 = vpack.c.bf16 %v723_v41, %v721_v36  ;;  %3727 = vst [vmem:[#allocation29_spill] sm:$0xff] %v2991_v45  ;;  %v2993_v46 = vpop.f32.mrb[6].mxu0 }
 0x203   : > { %728 = vxpose.xlu0.c.b16.start.end [1/1] (short) %v724_v42, 128  ;;  %3728 = vst [vmem:[#allocation30_spill] sm:$0xff] %v2993_v46  ;;  %v2995_v47 = vpop.f32.mrb[7].mxu0 }
 0x204   : > { %744 = vxpose.xlu1.c.b16.start.end [1/1] (short) %v725_v43, 128  ;;  %3729 = vst [vmem:[#allocation31_spill] sm:$0xff] %v2995_v47 }
 0x269   : > { %v736_v48 = vpop.trf.xlu0 }
 0x26a   : > { %1857 = vmatmul.mubr.msk.bf16.vlgmr.msra.gmra.mrb[8].mxu0 %vm526_vm0, %v736_v48  ;;  %v752_v56 = vpop.trf.xlu1 }
 0x26b   : > { %850 = vmatprep.mubr.bf16.mxu0 %v3661_v0 }
 0x26d   : > { %v737_v49 = vpop.trf.xlu0 }
 0x26e   : > { %v753_v57 = vpop.trf.xlu1 }
 0x271   : > { %v738_v50 = vpop.trf.xlu0 }
 0x272   : > { %1858 = vmatmul.mubr.msk.bf16.gmra.mrb[12].mxu0 %vm526_vm0, %v737_v49  ;;  %v754_v58 = vpop.trf.xlu1 }
 0x273   : > { %860 = vmatprep.mubr.bf16.mxu0 %v3661_v0 }
 0x275   : > { %v739_v51 = vpop.trf.xlu0 }
 0x276   : > { %v755_v59 = vpop.trf.xlu1 }
 0x279   : > { %v740_v52 = vpop.trf.xlu0 }
 0x27a   : > { %1859 = vmatmul.mubr.msk.bf16.gmra.mrb[16].mxu0 %vm526_vm0, %v738_v50  ;;  %v756_v60 = vpop.trf.xlu1 }
 0x27b   : > { %870 = vmatprep.mubr.bf16.mxu0 %v3661_v0 }
 0x27d   : > { %v741_v53 = vpop.trf.xlu0 }
 0x27e   : > { %v757_v61 = vpop.trf.xlu1 }
 0x281   : > { %v742_v54 = vpop.trf.xlu0 }
 0x282   : > { %1860 = vmatmul.mubr.msk.bf16.gmra.mrb[20].mxu0 %vm526_vm0, %v739_v51  ;;  %v758_v62 = vpop.trf.xlu1 }
 0x283   : > { %880 = vmatprep.mubr.bf16.mxu0 %v3661_v0 }
 0x285   : > { %v743_v55 = vpop.trf.xlu0 }
 0x286   : > { %v759_v63 = vpop.trf.xlu1 }
 0x28a   : > { %1861 = vmatmul.mubr.msk.bf16.gmra.mrb[24].mxu0 %vm526_vm0, %v740_v52 }
 0x28b   : > { %890 = vmatprep.mubr.bf16.mxu0 %v3661_v0 }
 0x292   : > { %1862 = vmatmul.mubr.msk.bf16.gmra.mrb[28].mxu0 %vm526_vm0, %v741_v53 }
 0x293   : > { %900 = vmatprep.mubr.bf16.mxu0 %v3661_v0 }
 0x29a   : > { %1863 = vmatmul.mubr.msk.bf16.gmra.mrb[32].mxu0 %vm526_vm0, %v742_v54 }
 0x29b   : > { %910 = vmatprep.mubr.bf16.mxu0 %v3661_v0 }
 0x2a2   : > { %1864 = vmatmul.mubr.msk.bf16.gmra.mrb[36].mxu0 %vm526_vm0, %v743_v55 }
 0x2a3   : > { %920 = vmatprep.mubr.bf16.mxu0 %v3661_v0 }
 0x2aa   : > { %1865 = vmatmul.mubr.msk.bf16.gmra.mrb[40].mxu0 %vm526_vm0, %v752_v56 }
 0x2ab   : > { %930 = vmatprep.mubr.bf16.mxu0 %v3661_v0 }
 0x2b2   : > { %1866 = vmatmul.mubr.msk.bf16.gmra.mrb[44].mxu0 %vm526_vm0, %v753_v57 }
 0x2b3   : > { %940 = vmatprep.mubr.bf16.mxu0 %v3661_v0 }
 0x2ba   : > { %1867 = vmatmul.mubr.msk.bf16.gmra.mrb[48].mxu0 %vm526_vm0, %v754_v58 }
 0x2bb   : > { %950 = vmatprep.mubr.bf16.mxu0 %v3661_v0 }
 0x2c2   : > { %1868 = vmatmul.mubr.msk.bf16.gmra.mrb[52].mxu0 %vm526_vm0, %v755_v59 }
 0x2c3   : > { %960 = vmatprep.mubr.bf16.mxu0 %v3661_v0 }
 0x2ca   : > { %1869 = vmatmul.mubr.msk.bf16.gmra.mrb[56].mxu0 %vm526_vm0, %v756_v60 }
 0x2cb   : > { %970 = vmatprep.mubr.bf16.mxu0 %v3661_v0 }
 0x2d2   : > { %1870 = vmatmul.mubr.msk.bf16.gmra.mrb[60].mxu0 %vm526_vm0, %v757_v61 }
 0x2d3   : > { %980 = vmatprep.mubr.bf16.mxu0 %v3661_v0 }
 0x2da   : > { %1871 = vmatmul.mubr.msk.bf16.gmra.mrb[64].mxu0 %vm526_vm0, %v758_v62 }
 0x2db   : > { %990 = vmatprep.mubr.bf16.mxu0 %v3661_v0 }
 0x2e2   : > { %1872 = vmatmul.mubr.msk.bf16.gmra.mrb[68].mxu0 %vm526_vm0, %v759_v63 }
 0x33d   : > { %v3028_v1 = vpop.f32.mrb[8].mxu0 }
 0x33e   : > { %v3030_v2 = vpop.f32.mrb[9].mxu0 }
 0x33f   : > { %v3032_v3 = vpop.f32.mrb[10].mxu0  ;;  %v1001_v4 = vmax.f32 %v3028_v1, %v3030_v2 }
 0x340   : > { %v3036_v5 = vpop.f32.mrb[11].mxu0 }
 0x341   : > { %1002 = vmax.xlane.f32.xlu0 %v1001_v4  ;;  %v1004_v6 = vmax.f32 %v3032_v3, %v3036_v5 }
 0x343   : > { %1005 = vmax.xlane.f32.xlu1 %v1004_v6 }
 0x345   : > { %v3040_v7 = vpop.f32.mrb[12].mxu0 }
 0x346   : > { %v3042_v8 = vpop.f32.mrb[13].mxu0 }
 0x347   : > { %v3044_v9 = vpop.f32.mrb[14].mxu0  ;;  %v1007_v10 = vmax.f32 %v3040_v7, %v3042_v8 }
 0x348   : > { %v3048_v11 = vpop.f32.mrb[15].mxu0 }
 0x349   : > { %1008 = vmax.xlane.f32.xlu0 %v1007_v10  ;;  %v1010_v12 = vmax.f32 %v3044_v9, %v3048_v11 }
 0x34d   : > { %1011 = vmax.xlane.f32.xlu0 %v1010_v12  ;;  %v3052_v13 = vpop.f32.mrb[16].mxu0 }
 0x34e   : > { %v3054_v14 = vpop.f32.mrb[17].mxu0 }
 0x34f   : > { %v3056_v15 = vpop.f32.mrb[18].mxu0  ;;  %v1013_v16 = vmax.f32 %v3052_v13, %v3054_v14 }
 0x350   : > { %v3060_v17 = vpop.f32.mrb[19].mxu0 }
 0x351   : > { %1014 = vmax.xlane.f32.xlu1 %v1013_v16  ;;  %v1016_v18 = vmax.f32 %v3056_v15, %v3060_v17 }
 0x353   : > { %1017 = vmax.xlane.f32.xlu0 %v1016_v18 }
 0x355   : > { %v3064_v19 = vpop.f32.mrb[20].mxu0 }
 0x356   : > { %v3066_v20 = vpop.f32.mrb[21].mxu0 }
 0x357   : > { %v3068_v21 = vpop.f32.mrb[22].mxu0  ;;  %v1019_v22 = vmax.f32 %v3064_v19, %v3066_v20 }
 0x358   : > { %v3072_v23 = vpop.f32.mrb[23].mxu0 }
 0x359   : > { %1020 = vmax.xlane.f32.xlu1 %v1019_v22  ;;  %v1022_v24 = vmax.f32 %v3068_v21, %v3072_v23 }
 0x35b   : > { %1023 = vmax.xlane.f32.xlu0 %v1022_v24 }
 0x35d   : > { %v3076_v25 = vpop.f32.mrb[24].mxu0 }
 0x35e   : > { %v3078_v26 = vpop.f32.mrb[25].mxu0 }
 0x35f   : > { %v3080_v27 = vpop.f32.mrb[26].mxu0  ;;  %v1025_v28 = vmax.f32 %v3076_v25, %v3078_v26 }
 0x360   : > { %v3084_v29 = vpop.f32.mrb[27].mxu0 }
 0x361   : > { %1026 = vmax.xlane.f32.xlu1 %v1025_v28  ;;  %v1028_v30 = vmax.f32 %v3080_v27, %v3084_v29 }
 0x363   : > { %1029 = vmax.xlane.f32.xlu0 %v1028_v30 }
 0x365   : > { %v3088_v31 = vpop.f32.mrb[28].mxu0 }
 0x366   : > { %v3090_v32 = vpop.f32.mrb[29].mxu0 }
 0x367   : > { %v3092_v33 = vpop.f32.mrb[30].mxu0  ;;  %v1031_v34 = vmax.f32 %v3088_v31, %v3090_v32 }
 0x368   : > { %v3096_v35 = vpop.f32.mrb[31].mxu0 }
 0x369   : > { %1032 = vmax.xlane.f32.xlu1 %v1031_v34  ;;  %v1034_v36 = vmax.f32 %v3092_v33, %v3096_v35 }
 0x36b   : > { %1035 = vmax.xlane.f32.xlu0 %v1034_v36 }
 0x36d   : > { %v3100_v37 = vpop.f32.mrb[32].mxu0 }
 0x36e   : > { %v3102_v38 = vpop.f32.mrb[33].mxu0 }
 0x36f   : > { %v3104_v39 = vpop.f32.mrb[34].mxu0  ;;  %v1037_v40 = vmax.f32 %v3100_v37, %v3102_v38 }
 0x370   : > { %v3108_v41 = vpop.f32.mrb[35].mxu0 }
 0x371   : > { %1038 = vmax.xlane.f32.xlu1 %v1037_v40  ;;  %v1040_v42 = vmax.f32 %v3104_v39, %v3108_v41 }
 0x373   : > { %1041 = vmax.xlane.f32.xlu0 %v1040_v42 }
 0x375   : > { %v3112_v43 = vpop.f32.mrb[36].mxu0 }
 0x376   : > { %v3114_v48 = vpop.f32.mrb[37].mxu0 }
 0x377   : > { %v3116_v49 = vpop.f32.mrb[38].mxu0  ;;  %v1043_v50 = vmax.f32 %v3112_v43, %v3114_v48 }
 0x378   : > { %v3120_v51 = vpop.f32.mrb[39].mxu0 }
 0x379   : > { %1044 = vmax.xlane.f32.xlu1 %v1043_v50  ;;  %v1046_v52 = vmax.f32 %v3116_v49, %v3120_v51 }
 0x37b   : > { %1047 = vmax.xlane.f32.xlu0 %v1046_v52 }
 0x37d   : > { %v3124_v53 = vpop.f32.mrb[40].mxu0 }
 0x37e   : > { %v3126_v54 = vpop.f32.mrb[41].mxu0 }
 0x37f   : > { %v3128_v55 = vpop.f32.mrb[42].mxu0  ;;  %v1049_v56 = vmax.f32 %v3124_v53, %v3126_v54 }
 0x380   : > { %v3132_v57 = vpop.f32.mrb[43].mxu0 }
 0x381   : > { %3730 = vst [vmem:[#allocation32_spill] sm:$0xff] %v3132_v57  ;;  %1050 = vmax.xlane.f32.xlu1 %v1049_v56  ;;  %v1052_v58 = vmax.f32 %v3128_v55, %v3132_v57 }
 0x383   : > { %1053 = vmax.xlane.f32.xlu0 %v1052_v58 }
 0x385   : > { %v3136_v59 = vpop.f32.mrb[44].mxu0 }
 0x386   : > { %3731 = vst [vmem:[#allocation33_spill] sm:$0xff] %v3136_v59  ;;  %v3138_v60 = vpop.f32.mrb[45].mxu0 }
 0x387   : > { %3732 = vst [vmem:[#allocation34_spill] sm:$0xff] %v3138_v60  ;;  %v3140_v61 = vpop.f32.mrb[46].mxu0  ;;  %v1055_v62 = vmax.f32 %v3136_v59, %v3138_v60 }
 0x388   : > { %3733 = vst [vmem:[#allocation35_spill] sm:$0xff] %v3140_v61  ;;  %v3144_v63 = vpop.f32.mrb[47].mxu0 }
 0x389   : > { %3734 = vst [vmem:[#allocation36_spill] sm:$0xff] %v3144_v63  ;;  %1056 = vmax.xlane.f32.xlu1 %v1055_v62  ;;  %v1058_v4 = vmax.f32 %v3140_v61, %v3144_v63  ;;  %v2029_v62 = vld [vmem:[#allocation9 + $0x8] sm:$0xff]  }
 0x38a   : > { %1856 = vmatmul.mubr.msk.bf16.gmra.mrb[4].mxu1 %vm526_vm0, %v2029_v62 }
 0x38b   : > { %1059 = vmax.xlane.f32.xlu0 %v1058_v4 }
 0x38d   : > { %v3148_v6 = vpop.f32.mrb[48].mxu0 }
 0x38e   : > { %3735 = vst [vmem:[#allocation37_spill] sm:$0xff] %v3148_v6  ;;  %v3150_v10 = vpop.f32.mrb[49].mxu0 }
 0x38f   : > { %3736 = vst [vmem:[#allocation38_spill] sm:$0xff] %v3150_v10  ;;  %v3152_v12 = vpop.f32.mrb[50].mxu0  ;;  %v1061_v16 = vmax.f32 %v3148_v6, %v3150_v10 }
 0x390   : > { %3737 = vst [vmem:[#allocation39_spill] sm:$0xff] %v3152_v12  ;;  %v3156_v18 = vpop.f32.mrb[51].mxu0 }
 0x391   : > { %3738 = vst [vmem:[#allocation40_spill] sm:$0xff] %v3156_v18  ;;  %1062 = vmax.xlane.f32.xlu1 %v1061_v16  ;;  %v1064_v22 = vmax.f32 %v3152_v12, %v3156_v18 }
 0x393   : > { %1065 = vmax.xlane.f32.xlu0 %v1064_v22 }
 0x395   : > { %v3160_v24 = vpop.f32.mrb[52].mxu0 }
 0x396   : > { %3739 = vst [vmem:[#allocation41_spill] sm:$0xff] %v3160_v24  ;;  %v3162_v28 = vpop.f32.mrb[53].mxu0 }
 0x397   : > { %3740 = vst [vmem:[#allocation42_spill] sm:$0xff] %v3162_v28  ;;  %v3164_v30 = vpop.f32.mrb[54].mxu0  ;;  %v1067_v34 = vmax.f32 %v3160_v24, %v3162_v28 }
 0x398   : > { %3741 = vst [vmem:[#allocation43_spill] sm:$0xff] %v3164_v30  ;;  %v3168_v36 = vpop.f32.mrb[55].mxu0 }
 0x399   : > { %3742 = vst [vmem:[#allocation44_spill] sm:$0xff] %v3168_v36  ;;  %1068 = vmax.xlane.f32.xlu1 %v1067_v34  ;;  %v1070_v40 = vmax.f32 %v3164_v30, %v3168_v36 }
 0x39b   : > { %1071 = vmax.xlane.f32.xlu0 %v1070_v40 }
 0x39d   : > { %v3172_v42 = vpop.f32.mrb[56].mxu0 }
 0x39e   : > { %v3174_v50 = vpop.f32.mrb[57].mxu0 }
 0x39f   : > { %v3176_v52 = vpop.f32.mrb[58].mxu0 }
 0x3a0   : > { %v3180_v58 = vpop.f32.mrb[59].mxu0 }
 0x3a5   : > { %v3184_v4 = vpop.f32.mrb[60].mxu0 }
 0x3a6   : > { %v3186_v16 = vpop.f32.mrb[61].mxu0 }
 0x3a7   : > { %v3188_v22 = vpop.f32.mrb[62].mxu0 }
 0x3a8   : > { %v3192_v40 = vpop.f32.mrb[63].mxu0 }
 0x3ad   : > { %v3196_v56 = vpop.f32.mrb[64].mxu0 }
 0x3ae   : > { %v3198_v47 = vpop.f32.mrb[65].mxu0 }
 0x3af   : > { %v3200_v46 = vpop.f32.mrb[66].mxu0 }
 0x3b0   : > { %v3204_v45 = vpop.f32.mrb[67].mxu0 }
 0x3b5   : > { %v3208_v34 = vpop.f32.mrb[68].mxu0 }
 0x3b6   : > { %v3210_v36 = vpop.f32.mrb[69].mxu0 }
 0x3b7   : > { %v3212_v30 = vpop.f32.mrb[70].mxu0 }
 0x3b8   : > { %v3216_v28 = vpop.f32.mrb[71].mxu0 }
 0x3ce   : > { %v1003_v18 = vpop.xlane.xlu0 %1002 }
 0x3cf   : > { %v1097_v44 = vsub.f32 %v3028_v1, %v1003_v18  ;;  %v1098_v12 = vsub.f32 %v3030_v2, %v1003_v18 }
 0x3d0   : > { %v1006_v10 = vpop.xlane.xlu1 %1005 }
 0x3d1   : > { %v1161_v6 = vmul.f32 1.442695, %v1097_v44  ;;  %v1163_v63 = vmul.f32 1.442695, %v1098_v12  ;;  %v1099_v61 = vsub.f32 %v3032_v3, %v1006_v10  ;;  %v1100_v0 = vsub.f32 %v3036_v5, %v1006_v10 }
 0x3d3   : > { %2031 = vpow2.f32 %v1161_v6  ;;  %v1165_v60 = vmul.f32 1.442695, %v1099_v61  ;;  %v1167_v59 = vmul.f32 1.442695, %v1100_v0 }
 0x3d4   : > { %2033 = vpow2.f32 %v1163_v63 }
 0x3d5   : > { %2035 = vpow2.f32 %v1165_v60 }
 0x3d6   : > { %2037 = vpow2.f32 %v1167_v59  ;;  %v1009_v24 = vpop.xlane.xlu0 %1008 }
 0x3d7   : > { %v1101_v62 = vsub.f32 %v3040_v7, %v1009_v24  ;;  %v1102_v1 = vsub.f32 %v3042_v8, %v1009_v24 }
 0x3d9   : > { %v1169_v57 = vmul.f32 1.442695, %v1101_v62  ;;  %v1171_v2 = vmul.f32 1.442695, %v1102_v1 }
 0x3da   : > { %v1012_v18 = vpop.xlane.xlu0 %1011 }
 0x3db   : > { %2039 = vpow2.f32 %v1169_v57  ;;  %v1103_v44 = vsub.f32 %v3044_v9, %v1012_v18  ;;  %v1104_v3 = vsub.f32 %v3048_v11, %v1012_v18 }
 0x3dc   : > { %2041 = vpow2.f32 %v1171_v2  ;;  %v3743_v2 = vmax.f32 %v3172_v42, %v3174_v50 }
 0x3dd   : > { %v3229_v5 = vpop.eup %2031  ;;  %v1173_v0 = vmul.f32 1.442695, %v1103_v44  ;;  %v1175_v61 = vmul.f32 1.442695, %v1104_v3 }
 0x3de   : > { %v3231_v60 = vpop.eup %2033  ;;  %v1015_v59 = vpop.xlane.xlu1 %1014 }
 0x3df   : > { %v3233_v63 = vpop.eup %2035  ;;  %2043 = vpow2.f32 %v1173_v0  ;;  %v1105_v7 = vsub.f32 %v3052_v13, %v1015_v59  ;;  %v1106_v8 = vsub.f32 %v3054_v14, %v1015_v59  ;;  %v1289_v9 = vadd.f32 %v3231_v60, %v3229_v5 }
 0x3e0   : > { %v3239_v57 = vpop.eup %2037  ;;  %2045 = vpow2.f32 %v1175_v61  ;;  %v1018_v11 = vpop.xlane.xlu0 %1017  ;;  %v3744_v0 = vmax.f32 %v3176_v52, %v3180_v58 }
 0x3e1   : > { %v1177_v6 = vmul.f32 1.442695, %v1105_v7  ;;  %v1179_v10 = vmul.f32 1.442695, %v1106_v8  ;;  %1290 = vadd.xlane.f32.xlu1 %v1289_v9  ;;  %v1107_v12 = vsub.f32 %v3056_v15, %v1018_v11  ;;  %v1108_v24 = vsub.f32 %v3060_v17, %v1018_v11 }
 0x3e2   : > { %v1292_v62 = vadd.f32 %v3239_v57, %v3233_v63 }
 0x3e3   : > { %2047 = vpow2.f32 %v1177_v6  ;;  %v1181_v13 = vmul.f32 1.442695, %v1107_v12  ;;  %v1183_v14 = vmul.f32 1.442695, %v1108_v24  ;;  %v3745_v24 = vmax.f32 %v3184_v4, %v3186_v16 }
 0x3e4   : > { %2049 = vpow2.f32 %v1179_v10  ;;  %1293 = vadd.xlane.f32.xlu0 %v1292_v62 }
 0x3e5   : > { %v3245_v1 = vpop.eup %2039  ;;  %2051 = vpow2.f32 %v1181_v13  ;;  %1074 = vmax.xlane.f32.xlu1 %v3743_v2 }
 0x3e6   : > { %v3250_v18 = vpop.eup %2041  ;;  %2053 = vpow2.f32 %v1183_v14  ;;  %v1021_v15 = vpop.xlane.xlu1 %1020 }
 0x3e7   : > { %v1109_v17 = vsub.f32 %v3064_v19, %v1021_v15  ;;  %v1110_v44 = vsub.f32 %v3066_v20, %v1021_v15  ;;  %v1295_v3 = vadd.f32 %v3250_v18, %v3245_v1 }
 0x3e8   : > { %1077 = vmax.xlane.f32.xlu0 %v3744_v0  ;;  %v1024_v61 = vpop.xlane.xlu0 %1023  ;;  %v3746_v0 = vmax.f32 %v3188_v22, %v3192_v40 }
 0x3e9   : > { %v3259_v59 = vpop.eup %2043  ;;  %v1185_v7 = vmul.f32 1.442695, %v1109_v17  ;;  %v1187_v8 = vmul.f32 1.442695, %v1110_v44  ;;  %1296 = vadd.xlane.f32.xlu1 %v1295_v3  ;;  %v1111_v9 = vsub.f32 %v3068_v21, %v1024_v61  ;;  %v1112_v11 = vsub.f32 %v3072_v23, %v1024_v61 }
 0x3ea   : > { %v3263_v19 = vpop.eup %2045 }
 0x3eb   : > { %2055 = vpow2.f32 %v1185_v7  ;;  %v1189_v20 = vmul.f32 1.442695, %v1111_v9  ;;  %v1191_v6 = vmul.f32 1.442695, %v1112_v11  ;;  %v1298_v10 = vadd.f32 %v3263_v19, %v3259_v59 }
 0x3ec   : > { %2057 = vpow2.f32 %v1187_v8  ;;  %v3747_v11 = vmax.f32 %v3196_v56, %v3198_v47 }
 0x3ed   : > { %v3267_v12 = vpop.eup %2047  ;;  %2059 = vpow2.f32 %v1189_v20  ;;  %1080 = vmax.xlane.f32.xlu1 %v3745_v24  ;;  %1299 = vadd.xlane.f32.xlu0 %v1298_v10 }
 0x3ee   : > { %v3272_v21 = vpop.eup %2049  ;;  %2061 = vpow2.f32 %v1191_v6  ;;  %v1027_v23 = vpop.xlane.xlu1 %1026 }
 0x3ef   : > { %v3274_v62 = vpop.eup %2051  ;;  %v1113_v13 = vsub.f32 %v3076_v25, %v1027_v23  ;;  %v1114_v14 = vsub.f32 %v3078_v26, %v1027_v23  ;;  %v1301_v2 = vadd.f32 %v3272_v21, %v3267_v12 }
 0x3f0   : > { %v3280_v15 = vpop.eup %2053  ;;  %v1030_v17 = vpop.xlane.xlu0 %1029 }
 0x3f1   : > { %v1193_v44 = vmul.f32 1.442695, %v1113_v13  ;;  %v1195_v3 = vmul.f32 1.442695, %v1114_v14  ;;  %1302 = vadd.xlane.f32.xlu1 %v1301_v2  ;;  %1083 = vmax.xlane.f32.xlu0 %v3746_v0  ;;  %v1115_v61 = vsub.f32 %v3080_v27, %v1030_v17  ;;  %v1116_v7 = vsub.f32 %v3084_v29, %v1030_v17 }
 0x3f2   : > { %v1304_v8 = vadd.f32 %v3280_v15, %v3274_v62  ;;  %v3748_v17 = vmax.f32 %v3200_v46, %v3204_v45 }
 0x3f3   : > { %2063 = vpow2.f32 %v1193_v44  ;;  %v1197_v25 = vmul.f32 1.442695, %v1115_v61  ;;  %v1199_v26 = vmul.f32 1.442695, %v1116_v7  ;;  %v3749_v7 = vmax.f32 %v3208_v34, %v3210_v36 }
 0x3f4   : > { %2065 = vpow2.f32 %v1195_v3 }
 0x3f5   : > { %v3289_v9 = vpop.eup %2055  ;;  %2067 = vpow2.f32 %v1197_v25  ;;  %1086 = vmax.xlane.f32.xlu1 %v3747_v11  ;;  %1305 = vadd.xlane.f32.xlu0 %v1304_v8 }
 0x3f6   : > { %v3294_v20 = vpop.eup %2057  ;;  %2069 = vpow2.f32 %v1199_v26  ;;  %v1033_v27 = vpop.xlane.xlu1 %1032 }
 0x3f7   : > { %v3296_v29 = vpop.eup %2059  ;;  %v1117_v6 = vsub.f32 %v3088_v31, %v1033_v27  ;;  %v1118_v10 = vsub.f32 %v3090_v32, %v1033_v27  ;;  %v1307_v24 = vadd.f32 %v3294_v20, %v3289_v9 }
 0x3f8   : > { %v3302_v23 = vpop.eup %2061  ;;  %v1036_v13 = vpop.xlane.xlu0 %1035 }
 0x3f9   : > { %v1201_v14 = vmul.f32 1.442695, %v1117_v6  ;;  %v1203_v2 = vmul.f32 1.442695, %v1118_v10  ;;  %1308 = vadd.xlane.f32.xlu1 %v1307_v24  ;;  %1089 = vmax.xlane.f32.xlu0 %v3748_v17  ;;  %v1119_v44 = vsub.f32 %v3092_v33, %v1036_v13  ;;  %v1120_v3 = vsub.f32 %v3096_v35, %v1036_v13 }
 0x3fa   : > { %v1310_v0 = vadd.f32 %v3302_v23, %v3296_v29  ;;  %v3750_v13 = vmax.f32 %v3212_v30, %v3216_v28 }
 0x3fb   : > { %2071 = vpow2.f32 %v1201_v14  ;;  %v1205_v31 = vmul.f32 1.442695, %v1119_v44  ;;  %v1207_v32 = vmul.f32 1.442695, %v1120_v3 }
 0x3fc   : > { %2073 = vpow2.f32 %v1203_v2 }
 0x3fd   : > { %v3311_v61 = vpop.eup %2063  ;;  %2075 = vpow2.f32 %v1205_v31  ;;  %1092 = vmax.xlane.f32.xlu1 %v3749_v7  ;;  %1311 = vadd.xlane.f32.xlu0 %v1310_v0 }
 0x3fe   : > { %v3316_v25 = vpop.eup %2065  ;;  %2077 = vpow2.f32 %v1207_v32  ;;  %v1039_v33 = vpop.xlane.xlu1 %1038 }
 0x3ff   : > { %v3318_v35 = vpop.eup %2067  ;;  %v1121_v26 = vsub.f32 %v3100_v37, %v1039_v33  ;;  %v1122_v8 = vsub.f32 %v3102_v38, %v1039_v33  ;;  %v1313_v11 = vadd.f32 %v3316_v25, %v3311_v61 }
 0x400   : > { %v3324_v27 = vpop.eup %2069  ;;  %v1042_v6 = vpop.xlane.xlu0 %1041 }
 0x401   : > { %v1209_v10 = vmul.f32 1.442695, %v1121_v26  ;;  %v1211_v24 = vmul.f32 1.442695, %v1122_v8  ;;  %1314 = vadd.xlane.f32.xlu1 %v1313_v11  ;;  %1095 = vmax.xlane.f32.xlu0 %v3750_v13  ;;  %v1123_v14 = vsub.f32 %v3104_v39, %v1042_v6  ;;  %v1124_v2 = vsub.f32 %v3108_v41, %v1042_v6 }
 0x402   : > { %v1316_v17 = vadd.f32 %v3324_v27, %v3318_v35 }
 0x403   : > { %2079 = vpow2.f32 %v1209_v10  ;;  %v1213_v37 = vmul.f32 1.442695, %v1123_v14  ;;  %v1215_v38 = vmul.f32 1.442695, %v1124_v2 }
 0x404   : > { %2081 = vpow2.f32 %v1211_v24 }
 0x405   : > { %v3333_v44 = vpop.eup %2071  ;;  %2083 = vpow2.f32 %v1213_v37  ;;  %1317 = vadd.xlane.f32.xlu0 %v1316_v17 }
 0x406   : > { %v3335_v3 = vpop.eup %2073  ;;  %2085 = vpow2.f32 %v1215_v38  ;;  %v1045_v31 = vpop.xlane.xlu1 %1044 }
 0x407   : > { %v3337_v32 = vpop.eup %2075  ;;  %v1125_v39 = vsub.f32 %v3112_v43, %v1045_v31  ;;  %v1126_v41 = vsub.f32 %v3114_v48, %v1045_v31  ;;  %v1319_v0 = vadd.f32 %v3335_v3, %v3333_v44 }
 0x408   : > { %v3343_v7 = vpop.eup %2077  ;;  %v1048_v33 = vpop.xlane.xlu0 %1047 }
 0x409   : > { %v1217_v26 = vmul.f32 1.442695, %v1125_v39  ;;  %v1219_v8 = vmul.f32 1.442695, %v1126_v41  ;;  %1320 = vadd.xlane.f32.xlu1 %v1319_v0  ;;  %v1127_v11 = vsub.f32 %v3116_v49, %v1048_v33  ;;  %v1128_v6 = vsub.f32 %v3120_v51, %v1048_v33  ;;  %v3751_v0 = vld [vmem:[#allocation32_spill] sm:$0xff] }
 0x40a   : > { %v1322_v10 = vadd.f32 %v3343_v7, %v3337_v32 }
 0x40b   : > { %2087 = vpow2.f32 %v1217_v26  ;;  %v1221_v43 = vmul.f32 1.442695, %v1127_v11  ;;  %v1223_v24 = vmul.f32 1.442695, %v1128_v6 }
 0x40c   : > { %2089 = vpow2.f32 %v1219_v8  ;;  %1323 = vadd.xlane.f32.xlu0 %v1322_v10 }
 0x40d   : > { %v3349_v48 = vpop.eup %2079  ;;  %2091 = vpow2.f32 %v1221_v43 }
 0x40e   : > { %v3351_v13 = vpop.eup %2081  ;;  %2093 = vpow2.f32 %v1223_v24  ;;  %v1051_v14 = vpop.xlane.xlu1 %1050  ;;  %v3755_v24 = vld [vmem:[#allocation34_spill] sm:$0xff] }
 0x40f   : > { %v3353_v2 = vpop.eup %2083  ;;  %v1129_v49 = vsub.f32 %v3124_v53, %v1051_v14  ;;  %v1130_v51 = vsub.f32 %v3126_v54, %v1051_v14  ;;  %v1325_v37 = vadd.f32 %v3351_v13, %v3349_v48 }
 0x410   : > { %v3359_v38 = vpop.eup %2085  ;;  %v1054_v17 = vpop.xlane.xlu0 %1053 }
 0x411   : > { %v1225_v31 = vmul.f32 1.442695, %v1129_v49  ;;  %v1227_v39 = vmul.f32 1.442695, %v1130_v51  ;;  %1326 = vadd.xlane.f32.xlu1 %v1325_v37  ;;  %v1131_v41 = vsub.f32 %v3128_v55, %v1054_v17  ;;  %v1132_v33 = vsub.f32 %v3751_v0, %v1054_v17  ;;  %v3754_v55 = vld [vmem:[#allocation33_spill] sm:$0xff]  ;;  %v3758_v0 = vld [vmem:[#allocation36_spill] sm:$0xff] }
 0x412   : > { %v1328_v26 = vadd.f32 %v3359_v38, %v3353_v2 }
 0x413   : > { %2095 = vpow2.f32 %v1225_v31  ;;  %v1229_v53 = vmul.f32 1.442695, %v1131_v41  ;;  %v1231_v8 = vmul.f32 1.442695, %v1132_v33 }
 0x414   : > { %2097 = vpow2.f32 %v1227_v39  ;;  %1329 = vadd.xlane.f32.xlu0 %v1328_v26  ;;  %v3757_v39 = vld [vmem:[#allocation35_spill] sm:$0xff] }
 0x415   : > { %v3365_v54 = vpop.eup %2087  ;;  %2099 = vpow2.f32 %v1229_v53 }
 0x416   : > { %3752 = vst [vmem:[#allocation32_spill] sm:$0xff] %v3365_v54  ;;  %v3367_v11 = vpop.eup %2089  ;;  %2101 = vpow2.f32 %v1231_v8  ;;  %v1057_v6 = vpop.xlane.xlu1 %1056 }
 0x417   : > { %v3369_v10 = vpop.eup %2091  ;;  %v1133_v43 = vsub.f32 %v3754_v55, %v1057_v6  ;;  %v1134_v14 = vsub.f32 %v3755_v24, %v1057_v6  ;;  %v1331_v49 = vadd.f32 %v3367_v11, %v3365_v54  ;;  %v3766_v54 = vld [vmem:[#allocation40_spill] sm:$0xff] }
 0x418   : > { %3753 = vst [vmem:[#allocation45_spill] sm:$0xff] %v3369_v10  ;;  %v3375_v51 = vpop.eup %2093  ;;  %v1060_v37 = vpop.xlane.xlu0 %1059 }
 0x419   : > { %3756 = vst [vmem:[#allocation33_spill] sm:$0xff] %v3375_v51  ;;  %v1233_v17 = vmul.f32 1.442695, %v1133_v43  ;;  %v1235_v31 = vmul.f32 1.442695, %v1134_v14  ;;  %1332 = vadd.xlane.f32.xlu1 %v1331_v49  ;;  %v1135_v41 = vsub.f32 %v3757_v39, %v1060_v37  ;;  %v1136_v33 = vsub.f32 %v3758_v0, %v1060_v37  ;;  %v3762_v14 = vld [vmem:[#allocation37_spill] sm:$0xff] }
 0x41a   : > { %v1334_v26 = vadd.f32 %v3375_v51, %v3369_v10  ;;  %v3763_v37 = vld [vmem:[#allocation38_spill] sm:$0xff] }
 0x41b   : > { %2103 = vpow2.f32 %v1233_v17  ;;  %v1237_v53 = vmul.f32 1.442695, %v1135_v41  ;;  %v1239_v8 = vmul.f32 1.442695, %v1136_v33 }
 0x41c   : > { %2105 = vpow2.f32 %v1235_v31  ;;  %1335 = vadd.xlane.f32.xlu0 %v1334_v26  ;;  %v3765_v26 = vld [vmem:[#allocation39_spill] sm:$0xff] }
 0x41d   : > { %v3381_v6 = vpop.eup %2095  ;;  %2107 = vpow2.f32 %v1237_v53 }
 0x41e   : > { %3759 = vst [vmem:[#allocation34_spill] sm:$0xff] %v3381_v6  ;;  %v3383_v55 = vpop.eup %2097  ;;  %2109 = vpow2.f32 %v1239_v8  ;;  %v1063_v43 = vpop.xlane.xlu1 %1062 }
 0x41f   : > { %3760 = vst [vmem:[#allocation35_spill] sm:$0xff] %v3383_v55  ;;  %v3385_v24 = vpop.eup %2099  ;;  %v1137_v49 = vsub.f32 %v3762_v14, %v1063_v43  ;;  %v1138_v39 = vsub.f32 %v3763_v37, %v1063_v43  ;;  %v1337_v17 = vadd.f32 %v3383_v55, %v3381_v6 }
 0x420   : > { %3761 = vst [vmem:[#allocation36_spill] sm:$0xff] %v3385_v24  ;;  %v3391_v41 = vpop.eup %2101  ;;  %v1066_v31 = vpop.xlane.xlu0 %1065 }
 0x421   : > { %3764 = vst [vmem:[#allocation37_spill] sm:$0xff] %v3391_v41  ;;  %v1241_v0 = vmul.f32 1.442695, %v1137_v49  ;;  %v1243_v33 = vmul.f32 1.442695, %v1138_v39  ;;  %1338 = vadd.xlane.f32.xlu1 %v1337_v17  ;;  %v1139_v53 = vsub.f32 %v3765_v26, %v1066_v31  ;;  %v1140_v8 = vsub.f32 %v3766_v54, %v1066_v31  ;;  %v3767_v17 = vld [vmem:[#allocation41_spill] sm:$0xff] }
 0x422   : > { %v1340_v10 = vadd.f32 %v3391_v41, %v3385_v24  ;;  %v3768_v54 = vld [vmem:[#allocation42_spill] sm:$0xff]  ;;  %v3770_v24 = vld [vmem:[#allocation44_spill] sm:$0xff] }
 0x423   : > { %2111 = vpow2.f32 %v1241_v0  ;;  %v1245_v14 = vmul.f32 1.442695, %v1139_v53  ;;  %v1247_v51 = vmul.f32 1.442695, %v1140_v8 }
 0x424   : > { %2113 = vpow2.f32 %v1243_v33  ;;  %1341 = vadd.xlane.f32.xlu0 %v1340_v10 }
 0x425   : > { %v3397_v43 = vpop.eup %2103  ;;  %2115 = vpow2.f32 %v1245_v14  ;;  %v3769_v14 = vld [vmem:[#allocation43_spill] sm:$0xff] }
 0x426   : > { %v3399_v37 = vpop.eup %2105  ;;  %2117 = vpow2.f32 %v1247_v51  ;;  %v1069_v49 = vpop.xlane.xlu1 %1068 }
 0x427   : > { %v3401_v39 = vpop.eup %2107  ;;  %v1141_v26 = vsub.f32 %v3767_v17, %v1069_v49  ;;  %v1142_v31 = vsub.f32 %v3768_v54, %v1069_v49  ;;  %v1343_v0 = vadd.f32 %v3399_v37, %v3397_v43 }
 0x428   : > { %v3407_v53 = vpop.eup %2109  ;;  %v1072_v33 = vpop.xlane.xlu0 %1071 }
 0x429   : > { %v1249_v10 = vmul.f32 1.442695, %v1141_v26  ;;  %v1251_v8 = vmul.f32 1.442695, %v1142_v31  ;;  %1344 = vadd.xlane.f32.xlu1 %v1343_v0  ;;  %v1143_v6 = vsub.f32 %v3769_v14, %v1072_v33  ;;  %v1144_v51 = vsub.f32 %v3770_v24, %v1072_v33 }
 0x42a   : > { %v1346_v41 = vadd.f32 %v3407_v53, %v3401_v39 }
 0x42b   : > { %2119 = vpow2.f32 %v1249_v10  ;;  %v1253_v17 = vmul.f32 1.442695, %v1143_v6  ;;  %v1255_v55 = vmul.f32 1.442695, %v1144_v51 }
 0x42c   : > { %2121 = vpow2.f32 %v1251_v8  ;;  %1347 = vadd.xlane.f32.xlu0 %v1346_v41 }
 0x42d   : > { %v3413_v49 = vpop.eup %2111  ;;  %2123 = vpow2.f32 %v1253_v17 }
 0x42e   : > { %3771 = vst [vmem:[#allocation38_spill] sm:$0xff] %v3413_v49  ;;  %v3415_v54 = vpop.eup %2113  ;;  %2125 = vpow2.f32 %v1255_v55 }
 0x42f   : > { %v3417_v26 = vpop.eup %2115  ;;  %v1349_v31 = vadd.f32 %v3415_v54, %v3413_v49 }
 0x430   : > { %3772 = vst [vmem:[#allocation39_spill] sm:$0xff] %v3417_v26  ;;  %v3421_v24 = vpop.eup %2117 }
 0x431   : > { %3773 = vst [vmem:[#allocation40_spill] sm:$0xff] %v3421_v24  ;;  %1350 = vadd.xlane.f32.xlu1 %v1349_v31  ;;  %v1352_v6 = vadd.f32 %v3421_v24, %v3417_v26 }
 0x433   : > { %1353 = vadd.xlane.f32.xlu0 %v1352_v6 }
 0x435   : > { %v3425_v0 = vpop.eup %2119 }
 0x436   : > { %3774 = vst [vmem:[#allocation41_spill] sm:$0xff] %v3425_v0  ;;  %v3427_v41 = vpop.eup %2121 }
 0x437   : > { %3775 = vst [vmem:[#allocation42_spill] sm:$0xff] %v3427_v41  ;;  %v3429_v33 = vpop.eup %2123  ;;  %v1355_v55 = vadd.f32 %v3427_v41, %v3425_v0 }
 0x438   : > { %3776 = vst [vmem:[#allocation43_spill] sm:$0xff] %v3429_v33  ;;  %v3433_v10 = vpop.eup %2125 }
 0x439   : > { %3777 = vst [vmem:[#allocation44_spill] sm:$0xff] %v3433_v10  ;;  %1356 = vadd.xlane.f32.xlu1 %v1355_v55  ;;  %v1358_v8 = vadd.f32 %v3433_v10, %v3429_v33 }
 0x43b   : > { %1359 = vadd.xlane.f32.xlu0 %v1358_v8 }
 0x46e   : > { %v1291_v14 = vpop.xlane.xlu1 %1290 }
 0x46f   : > { %2127 = vrcp.f32 %v1291_v14 }
 0x471   : > { %v1294_v51 = vpop.xlane.xlu0 %1293 }
 0x472   : > { %2129 = vrcp.f32 %v1294_v51  ;;  %v1075_v17 = vpop.xlane.xlu1 %1074 }
 0x473   : > { %v1145_v31 = vsub.f32 %v3172_v42, %v1075_v17  ;;  %v1146_v6 = vsub.f32 %v3174_v50, %v1075_v17 }
 0x475   : > { %v1257_v49 = vmul.f32 1.442695, %v1145_v31  ;;  %v1259_v26 = vmul.f32 1.442695, %v1146_v6  ;;  %v1078_v24 = vpop.xlane.xlu0 %1077 }
 0x476   : > { %v1147_v0 = vsub.f32 %v3176_v52, %v1078_v24  ;;  %v1148_v55 = vsub.f32 %v3180_v58, %v1078_v24  ;;  %v1297_v41 = vpop.xlane.xlu1 %1296 }
 0x477   : > { %2131 = vpow2.f32 %v1257_v49 }
 0x478   : > { %2133 = vpow2.f32 %v1259_v26  ;;  %v1261_v8 = vmul.f32 1.442695, %v1147_v0  ;;  %v1263_v33 = vmul.f32 1.442695, %v1148_v55 }
 0x479   : > { %v2128_v14 = vpop.eup %2127  ;;  %2135 = vrcp.f32 %v1297_v41 }
 0x47a   : > { %2137 = vpow2.f32 %v1261_v8  ;;  %v1081_v51 = vpop.xlane.xlu1 %1080  ;;  %v1300_v10 = vpop.xlane.xlu0 %1299  ;;  %v1418_v52 = vmul.f32 %v2128_v14, %v3231_v60  ;;  %v1417_v31 = vmul.f32 %v2128_v14, %v3229_v5 }
 0x47b   : > { %2139 = vpow2.f32 %v1263_v33  ;;  %v1149_v42 = vsub.f32 %v3184_v4, %v1081_v51  ;;  %v1150_v50 = vsub.f32 %v3186_v16, %v1081_v51 }
 0x47c   : > { %v2130_v17 = vpop.eup %2129  ;;  %2141 = vrcp.f32 %v1300_v10 }
 0x47d   : > { %v1265_v58 = vmul.f32 1.442695, %v1149_v42  ;;  %v1267_v24 = vmul.f32 1.442695, %v1150_v50  ;;  %v1420_v49 = vmul.f32 %v2130_v17, %v3239_v57  ;;  %v1419_v26 = vmul.f32 %v2130_v17, %v3233_v63 }
 0x47e   : > { %v1303_v0 = vpop.xlane.xlu1 %1302  ;;  %v1084_v41 = vpop.xlane.xlu0 %1083 }
 0x47f   : > { %2143 = vpow2.f32 %v1265_v58  ;;  %v1151_v33 = vsub.f32 %v3188_v22, %v1084_v41  ;;  %v1152_v4 = vsub.f32 %v3192_v40, %v1084_v41  ;;  %v1484_v16 = vpack.c.bf16 %v1420_v49, %v1418_v52 }
 0x480   : > { %2145 = vpow2.f32 %v1267_v24  ;;  %v1483_v10 = vpack.c.bf16 %v1419_v26, %v1417_v31 }
 0x481   : > { %v3449_v6 = vpop.eup %2131  ;;  %2147 = vrcp.f32 %v1303_v0  ;;  %v1269_v60 = vmul.f32 1.442695, %v1151_v33  ;;  %v1271_v55 = vmul.f32 1.442695, %v1152_v4  ;;  %1515 = vmatprep.subr.bf16.mxu1 %v1484_v16 }
 0x482   : > { %v3451_v57 = vpop.eup %2133  ;;  %1516 = vmatpush1.bf16.xpose.msra.mxu1 %v1483_v10  ;;  %v1087_v63 = vpop.xlane.xlu1 %1086 }
 0x483   : > { %v1306_v8 = vpop.xlane.xlu0 %1305  ;;  %v2136_v5 = vpop.eup %2135  ;;  %2149 = vpow2.f32 %v1269_v60  ;;  %v1153_v22 = vsub.f32 %v3196_v56, %v1087_v63  ;;  %v1154_v40 = vsub.f32 %v3198_v47, %v1087_v63  ;;  %v1361_v14 = vadd.f32 %v3451_v57, %v3449_v6 }
 0x484   : > { %v3457_v51 = vpop.eup %2137  ;;  %2151 = vpow2.f32 %v1271_v55  ;;  %v1422_v47 = vmul.f32 %v2136_v5, %v3250_v18  ;;  %v1421_v41 = vmul.f32 %v2136_v5, %v3245_v1 }
 0x485   : > { %v3459_v42 = vpop.eup %2139  ;;  %v1273_v50 = vmul.f32 1.442695, %v1153_v22  ;;  %v1275_v17 = vmul.f32 1.442695, %v1154_v40  ;;  %2153 = vrcp.f32 %v1306_v8  ;;  %1362 = vadd.xlane.f32.xlu1 %v1361_v14 }
 0x486   : > { %v2142_v52 = vpop.eup %2141  ;;  %v1309_v58 = vpop.xlane.xlu1 %1308  ;;  %v1364_v24 = vadd.f32 %v3459_v42, %v3457_v51 }
 0x487   : > { %v1090_v56 = vpop.xlane.xlu0 %1089  ;;  %2155 = vpow2.f32 %v1273_v50  ;;  %v1424_v0 = vmul.f32 %v2142_v52, %v3263_v19  ;;  %v1423_v31 = vmul.f32 %v2142_v52, %v3259_v59 }
 0x488   : > { %v1155_v49 = vsub.f32 %v3200_v46, %v1090_v56  ;;  %v1156_v26 = vsub.f32 %v3204_v45, %v1090_v56  ;;  %2157 = vpow2.f32 %v1275_v17  ;;  %1365 = vadd.xlane.f32.xlu0 %v1364_v24 }
 0x489   : > { %v3469_v33 = vpop.eup %2143  ;;  %v1486_v10 = vpack.c.bf16 %v1424_v0, %v1422_v47  ;;  %2159 = vrcp.f32 %v1309_v58  ;;  %v1485_v55 = vpack.c.bf16 %v1423_v31, %v1421_v41 }
 0x48a   : > { %v1277_v4 = vmul.f32 1.442695, %v1155_v49  ;;  %v1279_v16 = vmul.f32 1.442695, %v1156_v26  ;;  %v3471_v60 = vpop.eup %2145  ;;  %v1093_v18 = vpop.xlane.xlu1 %1092 }
 0x48b   : > { %v1312_v46 = vpop.xlane.xlu0 %1311  ;;  %v2148_v45 = vpop.eup %2147  ;;  %v1157_v19 = vsub.f32 %v3208_v34, %v1093_v18  ;;  %v1158_v63 = vsub.f32 %v3210_v36, %v1093_v18  ;;  %1517 = vmatprep.subr.bf16.mxu1 %v1486_v10  ;;  %v1367_v1 = vadd.f32 %v3471_v60, %v3469_v33 }
 0x48c   : > { %2161 = vpow2.f32 %v1277_v4  ;;  %1518 = vmatpush1.bf16.xpose.msra.mxu1 %v1485_v55  ;;  %v1426_v14 = vmul.f32 %v2148_v45, %v3272_v21  ;;  %v1425_v24 = vmul.f32 %v2148_v45, %v3267_v12 }
 0x48d   : > { %2163 = vpow2.f32 %v1279_v16  ;;  %v3477_v59 = vpop.eup %2149  ;;  %v1281_v8 = vmul.f32 1.442695, %v1157_v19  ;;  %v1283_v5 = vmul.f32 1.442695, %v1158_v63  ;;  %1368 = vadd.xlane.f32.xlu1 %v1367_v1 }
 0x48e   : > { %2165 = vrcp.f32 %v1312_v46  ;;  %v3479_v22 = vpop.eup %2151  ;;  %v1315_v36 = vpop.xlane.xlu1 %1314 }
 0x48f   : > { %v1096_v40 = vpop.xlane.xlu0 %1095  ;;  %v2154_v34 = vpop.eup %2153  ;;  %2167 = vpow2.f32 %v1281_v8  ;;  %v1370_v52 = vadd.f32 %v3479_v22, %v3477_v59 }
 0x490   : > { %v1159_v50 = vsub.f32 %v3212_v30, %v1096_v40  ;;  %v1160_v17 = vsub.f32 %v3216_v28, %v1096_v40  ;;  %2169 = vpow2.f32 %v1283_v5  ;;  %v1428_v58 = vmul.f32 %v2154_v34, %v3280_v15 }
 0x491   : > { %v1427_v56 = vmul.f32 %v2154_v34, %v3274_v62  ;;  %v3489_v47 = vpop.eup %2155  ;;  %1371 = vadd.xlane.f32.xlu0 %v1370_v52  ;;  %2171 = vrcp.f32 %v1315_v36 }
 0x492   : > { %v1285_v21 = vmul.f32 1.442695, %v1159_v50  ;;  %v1287_v49 = vmul.f32 1.442695, %v1160_v17  ;;  %v3491_v26 = vpop.eup %2157  ;;  %v1488_v30 = vpack.c.bf16 %v1428_v58, %v1426_v14 }
 0x493   : > { %v1318_v28 = vpop.xlane.xlu0 %1317  ;;  %v1487_v0 = vpack.c.bf16 %v1427_v56, %v1425_v24  ;;  %v1373_v41 = vadd.f32 %v3491_v26, %v3489_v47  ;;  %v2160_v15 = vpop.eup %2159 }
 0x494   : > { %2173 = vpow2.f32 %v1285_v21  ;;  %1519 = vmatprep.subr.bf16.mxu1 %v1488_v30  ;;  %v1430_v10 = vmul.f32 %v2160_v15, %v3294_v20  ;;  %v1429_v46 = vmul.f32 %v2160_v15, %v3289_v9  ;;  %v484_v15 = vld [vmem:[#allocation13 + $0x10] sm:$0xff] }
 0x495   : > { %2175 = vpow2.f32 %v1287_v49  ;;  %1520 = vmatpush1.bf16.xpose.msra.mxu1 %v1487_v0  ;;  %1374 = vadd.xlane.f32.xlu1 %v1373_v41 }
 0x496   : > { %v3495_v12 = vpop.eup %2161  ;;  %2177 = vrcp.f32 %v1318_v28  ;;  %v1321_v31 = vpop.xlane.xlu1 %1320 }
 0x497   : > { %v3497_v62 = vpop.eup %2163  ;;  %2179 = vrcp.f32 %v1321_v31 }
 0x498   : > { %v2166_v4 = vpop.eup %2165  ;;  %v1376_v16 = vadd.f32 %v3497_v62, %v3495_v12 }
 0x499   : > { %v1432_v18 = vmul.f32 %v2166_v4, %v3302_v23  ;;  %v1431_v55 = vmul.f32 %v2166_v4, %v3296_v29  ;;  %v3505_v45 = vpop.eup %2167  ;;  %v1324_v19 = vpop.xlane.xlu0 %1323 }
 0x49a   : > { %1377 = vadd.xlane.f32.xlu0 %v1376_v16  ;;  %v3507_v63 = vpop.eup %2169  ;;  %2181 = vrcp.f32 %v1324_v19 }
 0x49b   : > { %v1490_v1 = vpack.c.bf16 %v1432_v18, %v1430_v10  ;;  %v1489_v8 = vpack.c.bf16 %v1431_v55, %v1429_v46  ;;  %v1379_v5 = vadd.f32 %v3507_v63, %v3505_v45  ;;  %v2172_v20 = vpop.eup %2171  ;;  %v606_v10 = vld [vmem:[#allocation10 + $0x10] sm:$0xff]  ;;  %v3529_v46 = vpop.f32.mrb[4].mxu1 }
 0x49c   : > { %v1434_v34 = vmul.f32 %v2172_v20, %v3316_v25  ;;  %v1433_v50 = vmul.f32 %v2172_v20, %v3311_v61  ;;  %v3531_v19 = vpop.f32.mrb[5].mxu1 }
 0x49d   : > { %1521 = vmatprep.subr.bf16.mxu1 %v1490_v1  ;;  %1380 = vadd.xlane.f32.xlu1 %v1379_v5 }
 0x49e   : > { %v3511_v40 = vpop.eup %2173  ;;  %1522 = vmatpush1.bf16.xpose.msra.mxu1 %v1489_v8  ;;  %v1327_v29 = vpop.xlane.xlu1 %1326  ;;  %v485_v8 = vld [vmem:[#allocation13 + $0x18] sm:$0xff] }
 0x49f   : > { %v3513_v9 = vpop.eup %2175  ;;  %2183 = vrcp.f32 %v1327_v29  ;;  %v3535_v29 = vpop.f32.mrb[6].mxu1 }
 0x4a0   : > { %v2178_v23 = vpop.eup %2177  ;;  %v1382_v14 = vadd.f32 %v3513_v9, %v3511_v40 }
 0x4a1   : > { %v1436_v36 = vmul.f32 %v2178_v23, %v3324_v27  ;;  %v1435_v17 = vmul.f32 %v2178_v23, %v3318_v35  ;;  %v1330_v52 = vpop.xlane.xlu0 %1329  ;;  %v2180_v58 = vpop.eup %2179 }
 0x4a2   : > { %1383 = vadd.xlane.f32.xlu0 %v1382_v14  ;;  %2185 = vrcp.f32 %v1330_v52  ;;  %v1438_v49 = vmul.f32 %v2180_v58, %v3335_v3  ;;  %v1437_v35 = vmul.f32 %v2180_v58, %v3333_v44  ;;  %v3537_v23 = vpop.f32.mrb[7].mxu1  ;;  %v3780_v58 = vld [vmem:[#allocation32_spill] sm:$0xff] }
 0x4a3   : > { %v1492_v24 = vpack.c.bf16 %v1436_v36, %v1434_v34  ;;  %v1491_v56 = vpack.c.bf16 %v1435_v17, %v1433_v50  ;;  %v1565_v34 = vld [vmem:[#allocation16 + $0x8] sm:$0xff]  ;;  %v3779_v36 = vld [vmem:[#allocation45_spill] sm:$0xff]  ;;  %v1564_v17 = vld [vmem:[#allocation16] sm:$0xff] }
 0x4a4   : > { %v2182_v21 = vpop.eup %2181 }
 0x4a5   : > { %1523 = vmatprep.subr.bf16.mxu1 %v1492_v24  ;;  %v1440_v25 = vmul.f32 %v2182_v21, %v3343_v7  ;;  %v1439_v27 = vmul.f32 %v2182_v21, %v3337_v32 }
 0x4a6   : > { %1524 = vmatpush1.bf16.xpose.msra.mxu1 %v1491_v56  ;;  %v1333_v30 = vpop.xlane.xlu1 %1332 }
 0x4a7   : > { %v1494_v28 = vpack.c.bf16 %v1440_v25, %v1438_v49  ;;  %2187 = vrcp.f32 %v1333_v30  ;;  %v1493_v41 = vpack.c.bf16 %v1439_v27, %v1437_v35  ;;  %v3781_v49 = vld [vmem:[#allocation35_spill] sm:$0xff]  ;;  %v3782_v30 = vld [vmem:[#allocation37_spill] sm:$0xff]  ;;  %v3783_v35 = vld [vmem:[#allocation36_spill] sm:$0xff] }
 0x4a9   : > { %1525 = vmatprep.subr.bf16.mxu1 %v1494_v28  ;;  %v1336_v61 = vpop.xlane.xlu0 %1335  ;;  %v2184_v0 = vpop.eup %2183 }
 0x4aa   : > { %2189 = vrcp.f32 %v1336_v61  ;;  %v1442_v4 = vmul.f32 %v2184_v0, %v3351_v13  ;;  %v1441_v44 = vmul.f32 %v2184_v0, %v3349_v48 }
 0x4ac   : > { %v2186_v31 = vpop.eup %2185 }
 0x4ad   : > { %v1444_v3 = vmul.f32 %v2186_v31, %v3359_v38  ;;  %v1443_v32 = vmul.f32 %v2186_v31, %v3353_v2  ;;  %v607_v38 = vld [vmem:[#allocation10 + $0x18] sm:$0xff]  ;;  %v3778_v2 = vld [vmem:[#allocation33_spill] sm:$0xff] }
 0x4ae   : > { %1526 = vmatpush1.bf16.xpose.msra.mxu1 %v1493_v41  ;;  %498 = vperm.xlu1 %2019, %v484_v15   ;;  %v1339_v7 = vpop.xlane.xlu1 %1338  ;;  %v3784_v15 = vld [vmem:[#allocation34_spill] sm:$0xff] }
 0x4af   : > { %v1496_v16 = vpack.c.bf16 %v1444_v3, %v1442_v4  ;;  %2191 = vrcp.f32 %v1339_v7  ;;  %v1495_v13 = vpack.c.bf16 %v1443_v32, %v1441_v44 }
 0x4b1   : > { %1527 = vmatprep.subr.bf16.mxu1 %v1496_v16  ;;  %v1342_v18 = vpop.xlane.xlu0 %1341  ;;  %v2188_v55 = vpop.eup %2187 }
 0x4b2   : > { %2193 = vrcp.f32 %v1342_v18  ;;  %620 = vperm.xlu1 %2019, %v606_v10   ;;  %v1446_v5 = vmul.f32 %v2188_v55, %v3367_v11  ;;  %v1445_v24 = vmul.f32 %v2188_v55, %v3780_v58  ;;  %v3789_v58 = vld [vmem:[#allocation44_spill] sm:$0xff] }
 0x4b4   : > { %v2190_v1 = vpop.eup %2189 }
 0x4b5   : > { %v1448_v20 = vmul.f32 %v2190_v1, %v3778_v2  ;;  %v1447_v50 = vmul.f32 %v2190_v1, %v3779_v36  ;;  %v3785_v2 = vld [vmem:[#allocation40_spill] sm:$0xff] }
 0x4b6   : > { %1528 = vmatpush1.bf16.xpose.msra.mxu1 %v1495_v13  ;;  %625 = vperm.xlu1 %2019, %v607_v38   ;;  %v1345_v48 = vpop.xlane.xlu1 %1344 }
 0x4b7   : > { %v1498_v14 = vpack.c.bf16 %v1448_v20, %v1446_v5  ;;  %2195 = vrcp.f32 %v1345_v48  ;;  %v1497_v56 = vpack.c.bf16 %v1447_v50, %v1445_v24 }
 0x4b8   : > { %503 = vperm.xlu0 %2018, %v485_v8  }
 0x4b9   : > { %1529 = vmatprep.subr.bf16.mxu1 %v1498_v14  ;;  %v1348_v52 = vpop.xlane.xlu0 %1347  ;;  %v2192_v11 = vpop.eup %2191 }
 0x4ba   : > { %2197 = vrcp.f32 %v1348_v52  ;;  %1573 = vperm.xlu1 %2019, %v1565_v34   ;;  %v1450_v25 = vmul.f32 %v2192_v11, %v3781_v49  ;;  %v1449_v31 = vmul.f32 %v2192_v11, %v3784_v15  ;;  %v3787_v34 = vld [vmem:[#allocation38_spill] sm:$0xff]  ;;  %v3790_v11 = vld [vmem:[#allocation43_spill] sm:$0xff] }
 0x4bc   : > { %1568 = vperm.xlu0 %2018, %v1564_v17   ;;  %v2194_v21 = vpop.eup %2193  ;;  %v3788_v17 = vld [vmem:[#allocation42_spill] sm:$0xff] }
 0x4bd   : > { %v1452_v28 = vmul.f32 %v2194_v21, %v3782_v30  ;;  %v1451_v0 = vmul.f32 %v2194_v21, %v3783_v35 }
 0x4be   : > { %1530 = vmatpush1.bf16.xpose.msra.mxu1 %v1497_v56  ;;  %v1351_v27 = vpop.xlane.xlu1 %1350  ;;  %v3791_v56 = vld [vmem:[#allocation41_spill] sm:$0xff] }
 0x4bf   : > { %2199 = vrcp.f32 %v1351_v27  ;;  %v1500_v61 = vpack.c.bf16 %v1452_v28, %v1450_v25  ;;  %v1499_v3 = vpack.c.bf16 %v1451_v0, %v1449_v31 }
 0x4c0   : > { %v1354_v41 = vpop.xlane.xlu0 %1353 }
 0x4c1   : > { %1531 = vmatprep.subr.bf16.mxu1 %v1500_v61  ;;  %2201 = vrcp.f32 %v1354_v41  ;;  %v2196_v4 = vpop.eup %2195 }
 0x4c2   : > { %v1454_v16 = vmul.f32 %v2196_v4, %v3399_v37  ;;  %v1453_v38 = vmul.f32 %v2196_v4, %v3397_v43 }
 0x4c4   : > { %v2198_v7 = vpop.eup %2197 }
 0x4c5   : > { %v1456_v10 = vmul.f32 %v2198_v7, %v3407_v53  ;;  %v1455_v44 = vmul.f32 %v2198_v7, %v3401_v39  ;;  %v3786_v53 = vld [vmem:[#allocation39_spill] sm:$0xff] }
 0x4c6   : > { %1532 = vmatpush1.bf16.xpose.msra.mxu1 %v1499_v3  ;;  %v1357_v32 = vpop.xlane.xlu1 %1356 }
 0x4c7   : > { %2203 = vrcp.f32 %v1357_v32  ;;  %v1502_v18 = vpack.c.bf16 %v1456_v10, %v1454_v16  ;;  %v1501_v8 = vpack.c.bf16 %v1455_v44, %v1453_v38 }
 0x4c8   : > { %v1360_v55 = vpop.xlane.xlu0 %1359 }
 0x4c9   : > { %v2200_v13 = vpop.eup %2199  ;;  %1533 = vmatprep.subr.bf16.mxu1 %v1502_v18  ;;  %2205 = vrcp.f32 %v1360_v55 }
 0x4ca   : > { %v1458_v5 = vmul.f32 %v2200_v13, %v3415_v54  ;;  %v1457_v39 = vmul.f32 %v2200_v13, %v3787_v34 }
 0x4cb   : > { %v2202_v1 = vpop.eup %2201 }
 0x4cc   : > { %v1460_v20 = vmul.f32 %v2202_v1, %v3785_v2  ;;  %v1459_v48 = vmul.f32 %v2202_v1, %v3786_v53 }
 0x4ce   : > { %1534 = vmatpush1.bf16.xpose.msra.mxu1 %v1501_v8  ;;  %v1504_v37 = vpack.c.bf16 %v1460_v20, %v1458_v5  ;;  %v1503_v50 = vpack.c.bf16 %v1459_v48, %v1457_v39 }
 0x4d0   : > { %1535 = vmatprep.subr.bf16.mxu1 %v1504_v37  ;;  %v3793_v37 = vld [vmem:[#allocation29_spill] sm:$0xff] }
 0x4d1   : > { %v2204_v14 = vpop.eup %2203 }
 0x4d2   : > { %v1462_v52 = vmul.f32 %v2204_v14, %v3788_v17  ;;  %v1461_v21 = vmul.f32 %v2204_v14, %v3791_v56  ;;  %v3794_v17 = vld [vmem:[#allocation30_spill] sm:$0xff] }
 0x4d3   : > { %v2206_v36 = vpop.eup %2205 }
 0x4d4   : > { %v1464_v43 = vmul.f32 %v2206_v36, %v3789_v58  ;;  %v1463_v54 = vmul.f32 %v2206_v36, %v3790_v11 }
 0x4d6   : > { %1536 = vmatpush1.bf16.xpose.msra.mxu1 %v1503_v50  ;;  %v1506_v24 = vpack.c.bf16 %v1464_v43, %v1462_v52  ;;  %v1505_v49 = vpack.c.bf16 %v1463_v54, %v1461_v21  ;;  %v3795_v52 = vld [vmem:[#allocation31_spill] sm:$0xff] }
 0x4d8   : > { %1537 = vmatprep.subr.bf16.mxu1 %v1506_v24 }
 0x4de   : > { %1538 = vmatpush1.bf16.xpose.msra.mxu1 %v1505_v49 }
 0x512   : > { %v1363_v25 = vpop.xlane.xlu1 %1362 }
 0x513   : > { %2207 = vrcp.f32 %v1363_v25 }
 0x515   : > { %v1366_v30 = vpop.xlane.xlu0 %1365 }
 0x516   : > { %2209 = vrcp.f32 %v1366_v30 }
 0x51a   : > { %v1369_v28 = vpop.xlane.xlu1 %1368 }
 0x51b   : > { %2211 = vrcp.f32 %v1369_v28 }
 0x51d   : > { %v2208_v27 = vpop.eup %2207 }
 0x51e   : > { %v1372_v61 = vpop.xlane.xlu0 %1371  ;;  %v1466_v0 = vmul.f32 %v2208_v27, %v3451_v57  ;;  %v1465_v15 = vmul.f32 %v2208_v27, %v3449_v6 }
 0x51f   : > { %2213 = vrcp.f32 %v1372_v61 }
 0x520   : > { %v2210_v35 = vpop.eup %2209 }
 0x521   : > { %v1468_v41 = vmul.f32 %v2210_v35, %v3459_v42  ;;  %v1467_v31 = vmul.f32 %v2210_v35, %v3457_v51 }
 0x522   : > { %v1375_v4 = vpop.xlane.xlu1 %1374 }
 0x523   : > { %v1508_v3 = vpack.c.bf16 %v1468_v41, %v1466_v0  ;;  %v1507_v7 = vpack.c.bf16 %v1467_v31, %v1465_v15  ;;  %2215 = vrcp.f32 %v1375_v4  ;;  %v3796_v15 = vmov 0  }
 0x525   : > { %1539 = vmatprep.subr.bf16.mxu1 %v1508_v3  ;;  %v2212_v10 = vpop.eup %2211 }
 0x526   : > { %1540 = vmatpush1.bf16.xpose.msra.mxu1 %v1507_v7  ;;  %v1470_v44 = vmul.f32 %v2212_v10, %v3471_v60  ;;  %v1469_v42 = vmul.f32 %v2212_v10, %v3469_v33 }
 0x527   : > { %v1378_v16 = vpop.xlane.xlu0 %1377 }
 0x528   : > { %2217 = vrcp.f32 %v1378_v16 }
 0x529   : > { %v2214_v32 = vpop.eup %2213 }
 0x52a   : > { %v1381_v18 = vpop.xlane.xlu1 %1380  ;;  %v1472_v57 = vmul.f32 %v2214_v32, %v3479_v22  ;;  %v1471_v6 = vmul.f32 %v2214_v32, %v3477_v59  ;;  %v3792_v59 = vld [vmem:[#allocation28_spill] sm:$0xff] }
 0x52b   : > { %2219 = vrcp.f32 %v1381_v18 }
 0x52c   : > { %v1510_v51 = vpack.c.bf16 %v1472_v57, %v1470_v44  ;;  %v1509_v55 = vpack.c.bf16 %v1471_v6, %v1469_v42 }
 0x52d   : > { %v2216_v1 = vpop.eup %2215 }
 0x52e   : > { %v499_v13 = vpop.permute.xlu1 %498  ;;  %1541 = vmatprep.subr.bf16.mxu1 %v1510_v51  ;;  %v1474_v2 = vmul.f32 %v2216_v1, %v3491_v26  ;;  %v1473_v22 = vmul.f32 %v2216_v1, %v3489_v47 }
 0x52f   : > { %v1384_v38 = vpop.xlane.xlu0 %1383  ;;  %1542 = vmatpush1.bf16.xpose.msra.mxu1 %v1509_v55  ;;  %v578_v20 = vadd.f32 %v3792_v59, %v499_v13  ;;  %v580_v53 = vadd.f32 %v3793_v37, %v499_v13 }
 0x530   : > { %2221 = vrcp.f32 %v1384_v38 }
 0x531   : > { %v590_v43 = vmax.f32 %v578_v20, 0.0  ;;  %v591_v24 = vmax.f32 %v580_v53, 0.0 }
 0x532   : > { %v2218_v8 = vpop.eup %2217  ;;  %v621_v5 = vpop.permute.xlu1 %620 }
 0x533   : > { %v1476_v60 = vmul.f32 %v2218_v8, %v3497_v62  ;;  %v1475_v33 = vmul.f32 %v2218_v8, %v3495_v12  ;;  %v700_v48 = vadd.f32 %v3529_v46, %v621_v5  ;;  %v702_v14 = vadd.f32 %v3531_v19, %v621_v5 }
 0x535   : > { %v1512_v34 = vpack.c.bf16 %v1476_v60, %v1474_v2  ;;  %v1511_v39 = vpack.c.bf16 %v1475_v33, %v1473_v22  ;;  %v2220_v26 = vpop.eup %2219  ;;  %v708_v46 = vmax.f32 %v700_v48, 0.0  ;;  %v709_v11 = vmax.f32 %v702_v14, 0.0 }
 0x536   : > { %v626_v36 = vpop.permute.xlu1 %625  ;;  %v1478_v25 = vmul.f32 %v2220_v26, %v3507_v63 }
 0x537   : > { %1543 = vmatprep.subr.bf16.mxu1 %v1512_v34  ;;  %v504_v50 = vpop.permute.xlu0 %503  ;;  %v704_v62 = vadd.f32 %v3535_v29, %v626_v36  ;;  %v706_v47 = vadd.f32 %v3537_v23, %v626_v36  ;;  %v1477_v23 = vmul.f32 %v2220_v26, %v3505_v45 }
 0x538   : > { %v582_v12 = vadd.f32 %v3794_v17, %v504_v50  ;;  %v584_v58 = vadd.f32 %v3795_v52, %v504_v50  ;;  %1544 = vmatpush1.bf16.xpose.msra.mxu1 %v1511_v39 }
 0x539   : > { %v710_v54 = vmax.f32 %v704_v62, 0.0  ;;  %v711_v56 = vmax.f32 %v706_v47, 0.0 }
 0x53a   : > { %v2222_v19 = vpop.eup %2221  ;;  %v592_v21 = vmax.f32 %v582_v12, 0.0  ;;  %v593_v49 = vmax.f32 %v584_v58, 0.0  ;;  %v1574_v18 = vpop.permute.xlu1 %1573 }
 0x53b   : > { %v1480_v29 = vmul.f32 %v2222_v19, %v3513_v9  ;;  %v1479_v30 = vmul.f32 %v2222_v19, %v3511_v40  ;;  %v1560_v28 = vpack.c.bf16 %v710_v54, %v708_v46  ;;  %v1561_v35 = vpack.c.bf16 %v711_v56, %v709_v11  ;;  %v2030_v40 = vld [vmem:[#allocation15] sm:$0xff]   ;;  %v1569_v7 = vpop.permute.xlu0 %1568 }
 0x53c   : > { %v594_v27 = vpack.c.bf16 %v592_v21, %v590_v43  ;;  %v595_v61 = vpack.c.bf16 %v593_v49, %v591_v24 }
 0x53d   : > { %v1514_v0 = vpack.c.bf16 %v1480_v29, %v1478_v25  ;;  %v1513_v41 = vpack.c.bf16 %v1479_v30, %v1477_v23 }
 0x53e   : > { %1547 = vmatprep.mubr.bf16.mxu1 %v595_v61 }
 0x53f   : > { %1545 = vmatprep.subr.bf16.mxu1 %v1514_v0 }
 0x540   : > { %1546 = vmatpush1.bf16.xpose.msra.mxu1 %v1513_v41 }
 0x547   : > { %1548 = vmatmul.mubr.bf16.vlgmr.msra.gmra.mrb[8].mxu1 %v594_v27 }
 0x548   : > { %1617 = vmatprep.mubr.bf16.mxu1 %v3796_v15 }
 0x61a   : > { %v1549_v63 = vpop.f32.mrb[8].mxu1 }
 0x61b   : > { %v1551_v31 = vpop.f32.mrb[9].mxu1 }
 0x61c   : > { %v1553_v9 = vpop.f32.mrb[10].mxu1 }
 0x61d   : > { %v1558_v4 = vpack.c.bf16 %v1553_v9, %v1549_v63  ;;  %v1555_v45 = vpop.f32.mrb[11].mxu1 }
 0x61e   : > { %v1559_v3 = vpack.c.bf16 %v1555_v45, %v1551_v31 }
 0x620   : > { %1585 = vmatprep.subr.bf16.mxu1 %v1559_v3 }
 0x621   : > { %1586 = vmatpush1.bf16.msra.mxu1 %v1558_v4 }
 0x622   : > { %1587 = vmatprep.subr.bf16.mxu1 %v1561_v35 }
 0x625   : > { %1588 = vmatpush1.bf16.msra.mxu1 %v1560_v28 }
 0x628   : > { %1874 = vmatmul.mubr.msk.bf16.vlgmr.msra.gmra.mrb[12].mxu1 %vm1581_vm1, %v2030_v40 }
 0x6fb   : > { %v1619_v16 = vpop.f32.mrb[12].mxu1 }
 0x6fc   : > { %v1620_v10 = vadd.f32 %v1619_v16, %v1569_v7  ;;  %v1621_v32 = vpop.f32.mrb[13].mxu1 }
 0x6fd   : > { %v1622_v44 = vadd.f32 %v1621_v32, %v1569_v7  ;;  %v1623_v57 = vpop.f32.mrb[14].mxu1 }
 0x6fe   : > { %v1628_v42 = vmax.f32 %v1620_v10, 0.0  ;;  %v1624_v6 = vadd.f32 %v1623_v57, %v1574_v18  ;;  %v1625_v51 = vpop.f32.mrb[15].mxu1 }
 0x6ff   : > { %v1629_v55 = vmax.f32 %v1622_v44, 0.0  ;;  %v1626_v13 = vadd.f32 %v1625_v51, %v1574_v18 }
 0x700   : > { %1632 = vst [vmem:[%s468_s24] sm:$0xff] %v1628_v42  ;;  %v1630_v38 = vmax.f32 %v1624_v6, 0.0 }
 0x701   : > { %1633 = vst [vmem:[%s468_s24 + $0x8] sm:$0xff] %v1629_v55  ;;  %v1631_v1 = vmax.f32 %v1626_v13, 0.0 }
 0x702   : > { %1634 = vst [vmem:[%s468_s24 + $0x10] sm:$0xff] %v1630_v38 }
 0x703   : > { %1635 = vst [vmem:[%s468_s24 + $0x18] sm:$0xff] %v1631_v1 }
 0x704   : > { %2464 = shalt.err (!%p2461_p3)
}
 0x705   : > { %s2465_s14 = scalar_lea.hbm %s3589_s13, 512  ;;  %s2469_s21 = scalar_lea.hbm %s3797_s4, 1024 }
 0x706   : > { %p2466_p8 = scmp.ne.s32.totalorder %s3589_s13, %s2465_s14  ;;  %p2470_p6 = scmp.lt.u32.totalorder %s3589_s13, %s3797_s4 }
 0x707   : > { %p2471_p2 = scmp.lt.u32.totalorder %s2469_s21, %s2465_s14  ;;  %p2473_p4 = scmp.lt.u32.totalorder %s2465_s14, %s3589_s13 }
 0x708   : > { %p2467_p1 = pnand %p2466_p8, %p3798_p9 }
 0x709   : > { %p2472_p13 = por %p2471_p2, %p2470_p6 }
 0x70a   : > { %p2468_p12 = pneg %p2467_p1 }
 0x70b   : > { %p2474_p0 = por %p2473_p4, %p2472_p13 }
 0x70d   : > { %p2475_p7 = pnand %p2474_p0, %p2468_p12 }
 0x70f   : > { %2478 = shalt.err (!%p2475_p7)
}
 0x710   : > { %s2569_s2 = smov 256   ;;  %s2570_s12 = smov 16  }
 0x711   : > { %1911 = dma.vmem_to_hbm [thread:$0]  (%p3798_p9), %s3584_s26, 512, %s3589_s13, %s1637_s30, %s2569_s2, %s2569_s2, %s2570_s12  }
 0x712 PF: > { %s1667_s11 = sand.u32 1, %s2533_s27   ;;  %p3799_p5 = scmp.ne.s32.totalorder %s3715_s22, 0 }
 0x713   : > { %p3800_p11 = scmp.ge.s32.totalorder %s2553_s10, 2  ;;  %s1668_s24 = scalar_lea.sflag [#allocation6], %s1667_s11 }
 0x715   : > { %p1940_p10 = pnand %p3800_p11, %p3799_p5 }
 0x717   : > { %2528 = dma.done.wait (!%p1940_p10), %s1668_s24, 512  }
 0x718   : > { %2530 = vsyncadd (!%p1940_p10), %s1668_s24, 4294966784  ;;  %s30_s10 = sadd.s32 1, %s2553_s10   ;;  %s3801_s30 = sld [smem:[#allocation26_spill]] }
 0x719   : > { %p27_p3 = scmp.ge.s32.totalorder %s30_s10, 4   ;;  %s3802_s9 = sld [smem:[#allocation27_spill]] }
 0x71a   : > { %s3803_s27 = smov %s2537_s28  ;;  %s3804_s28 = smov %s2541_s29 }
 0x71b   : > { %s3805_s29 = smov %s2853_s17  ;;  %29 = sbr.rel (!%p27_p3) target bundleno = 19 (0x13), region = 138 }
 0x722   :  { %1673 = vsyncpa [#allocation5], 1 }
 0x723   :  { %1675 = vsyncpa [#allocation5 + $0x1], 1 }
 0x724   :  { %1676 = vsyncpa [#allocation8], 1 }
 0x725   :  { %1678 = vsyncpa [#allocation8 + $0x1], 1 }
 0x726   :  { %1679 = vsyncpa [#allocation11], 1 }
 0x727   :  { %1680 = vsyncpa [#allocation14], 1 }
 0x728   :  { %1681 = vsyncpa [#allocation17], 1 }
 0x729   :  { %1682 = vsyncpa [#allocation6], 1 }
 0x72a   :  { %1684 = vsyncpa [#allocation6 + $0x1], 1 }

</bundles_post_ra>
